<compile_context>
chip_gen: v7x
topology: tpu7x:2x2x1
jax: 0.10.0
libtpu: 0.0.40
codegen_flags: <defaults>
</compile_context>

<pallas_src>
import functools
import numpy as np

import jax
import jax.numpy as jnp
from jax.experimental import pallas as pl
from jax.experimental.pallas import tpu as pltpu


def _round_up(x, m):
    return -(-x // m) * m


def _largest_divisor(n, candidates):
    for c in candidates:
        if c <= n and n % c == 0:
            return c
    return None


# ---------------------------------------------------------------------------
# Kernel 1: one-time weight quantization (AsymWeightQuantizer, min-max, 4-bit)
# ---------------------------------------------------------------------------
def _quant_weight_kernel(w_ref, wq_ref, *, group_size, max_int):
    """Quantize-dequantize one (tk, tn) weight tile; groups along the last dim."""
    w = w_ref[...].astype(jnp.float32)                  # (tk, tn)
    tk, tn = w.shape
    g = group_size

    # Keep rows in sublanes: (tk, tn) -> (tk, tn//g, g), reduce the last axis.
    wg = w.reshape(tk, tn // g, g)
    max_val = jnp.max(wg, axis=-1, keepdims=True)
    min_val = jnp.min(wg, axis=-1, keepdims=True)
    scales = jnp.maximum(max_val - min_val, 1e-5) / max_int
    # True divisions (not reciprocal-multiply) to stay bit-faithful to the
    # PyTorch reference's rounding behaviour.
    zeros = jnp.clip(-jnp.round(min_val / scales), 0.0, max_int)
    q = jnp.clip(jnp.round(wg / scales) + zeros, 0.0, max_int)
    wq_ref[...] = ((q - zeros) * scales).reshape(tk, tn).astype(wq_ref.dtype)


def quantize_weight(weight, *, n_bits_w=4, group_size=16):
    """One-time fake-quantization of the (nx, nf) Conv1D weight -> bf16.

    Call this ONCE at parameter-load time and cache the result; pass the cached
    array to qconv1d_forward() every step.
    """
    if n_bits_w != 4:
        # TODO(synk): TwnQuantizer (n_bits_w=2) ternary path not implemented.
        raise NotImplementedError("only the 4-bit AsymWeightQuantizer path")
    nx, nf = weight.shape
    g = group_size if group_size > 0 else nf
    assert nf % g == 0
    max_int = float(2 ** n_bits_w - 1)

    # N tile: lane-dense multiple of 128 that keeps quant groups intact.
    tn = _largest_divisor(nf, [c for c in (512, 256, 128) if c % g == 0]) or nf
    # K (nx) tile: bound the block so very wide models stay inside scoped VMEM.
    if nx <= 512:
        tk, nx_pad, w_in = nx, nx, weight
    else:
        tk = 256
        nx_pad = _round_up(nx, tk)
        w_in = (jnp.pad(weight, ((0, nx_pad - nx), (0, 0)))
                if nx_pad != nx else weight)

    kernel = functools.partial(_quant_weight_kernel, group_size=g,
                               max_int=max_int)
    wq = pl.pallas_call(
        kernel,
        out_shape=jax.ShapeDtypeStruct((nx_pad, nf), jnp.bfloat16),
        grid=(nx_pad // tk, nf // tn),
        in_specs=[pl.BlockSpec((tk, tn), lambda i, j: (i, j))],
        out_specs=pl.BlockSpec((tk, tn), lambda i, j: (i, j)),
        compiler_params=pltpu.CompilerParams(
            dimension_semantics=("parallel", "parallel"),
            vmem_limit_bytes=32 * 1024 * 1024),
    )(w_in)
    return wq[:nx] if nx_pad != nx else wq


# ---------------------------------------------------------------------------
# Kernel 2: K-tiled matmul + bias (bf16 MXU operands, f32 accumulation)
# ---------------------------------------------------------------------------
def _matmul_bias_kernel(x_ref, w_ref, b_ref, o_ref, acc_ref):
    k = pl.program_id(2)

    @pl.when(k == 0)
    def _init():
        acc_ref[...] = jnp.zeros_like(acc_ref)

    # Cast activations to bf16 on the VPU here (instead of a wrapper-side
    # astype pass over HBM); weight is already bf16 from quantize_weight().
    acc_ref[...] += jnp.dot(x_ref[...].astype(jnp.bfloat16), w_ref[...],
                            preferred_element_type=jnp.float32)

    @pl.when(k == pl.num_programs(2) - 1)
    def _finalize():
        o_ref[...] = (acc_ref[...] + b_ref[...].astype(jnp.float32)
                      ).astype(o_ref.dtype)


def qconv1d_forward(x, wq, bias):
    """Per-step forward: out = x.reshape(-1, nx) @ wq + bias, reshaped back."""
    *lead, nx = x.shape
    nx_w, nf = wq.shape
    assert nx == nx_w
    M = int(np.prod(lead)) if lead else 1

    # --- N: pad nf up to a multiple of 128 so output stores are lane-dense.
    nf_pad = _round_up(nf, 128)
    tn = _largest_divisor(nf_pad, (512, 256, 128)) or nf_pad
    # --- K: tile nx so block sizes stay bounded regardless of model width.
    tk = _largest_divisor(nx, (512, 384, 320, 256, 192, 128, 64, 32, 16, 8)) or nx
    # --- M: big tiles (match tn) for throughput; single small tile for decode.
    if M <= 512:
        tm = _round_up(M, 8)
    else:
        tm = min((512, 256, 128), key=lambda c: ((-M) % c, -c))
    M_pad = _round_up(M, tm)
    # v7x has 2 TensorCores: make sure some "parallel" axis has >= 2 tiles.
    if M_pad // tm == 1 and nf_pad // tn == 1 and tn >= 256:
        tn //= 2

    x2 = x.reshape(M, nx)                    # no dtype cast in the wrapper
    if M_pad != M:
        x2 = jnp.pad(x2, ((0, M_pad - M), (0, 0)))
    w2 = wq if nf_pad == nf else jnp.pad(wq, ((0, 0), (0, nf_pad - nf)))
    b2 = bias.astype(jnp.float32).reshape(1, nf)
    if nf_pad != nf:
        b2 = jnp.pad(b2, ((0, 0), (0, nf_pad - nf)))

    grid = (M_pad // tm, nf_pad // tn, nx // tk)
    x_bytes = (nf_pad // tn) * M_pad * nx * x2.dtype.itemsize
    w_bytes = (M_pad // tm) * nx * nf_pad * 2
    o_bytes = M_pad * nf_pad * np.dtype(x.dtype).itemsize

    out = pl.pallas_call(
        _matmul_bias_kernel,
        out_shape=jax.ShapeDtypeStruct((M_pad, nf_pad), x.dtype),
        grid=grid,
        in_specs=[
            pl.BlockSpec((tm, tk), lambda i, j, k: (i, k)),   # activations
            pl.BlockSpec((tk, tn), lambda i, j, k: (k, j)),   # quantized weight
            pl.BlockSpec((1, tn), lambda i, j, k: (0, j)),    # bias slice
        ],
        out_specs=pl.BlockSpec((tm, tn), lambda i, j, k: (i, j)),
        scratch_shapes=[pltpu.VMEM((tm, tn), jnp.float32)],
        compiler_params=pltpu.CompilerParams(
            dimension_semantics=("parallel", "parallel", "arbitrary"),
            vmem_limit_bytes=32 * 1024 * 1024),
        cost_estimate=pl.CostEstimate(
            flops=2 * M_pad * nx * nf_pad,
            transcendentals=0,
            bytes_accessed=x_bytes + w_bytes + o_bytes),
    )(x2, w2, b2)

    if M_pad != M or nf_pad != nf:
        out = out[:M, :nf]
    return out.reshape(*lead, nf)


def qconv1d(x, weight, bias, *, n_bits_w=4, group_size=16):
    """Drop-in QConv1D.forward.  Prefer quantize_weight() once + cached wq."""
    wq = quantize_weight(weight, n_bits_w=n_bits_w, group_size=group_size)
    return qconv1d_forward(x, wq, bias)


# ---------------------------------------------------------------------------
# Pure-JAX reference (faithful f32 translation of the PyTorch forward)
# ---------------------------------------------------------------------------
def _reference(x, weight, bias, *, n_bits_w=4, group_size=16):
    nx, nf = weight.shape
    g = group_size if group_size > 0 else nf
    max_int = 2 ** n_bits_w - 1
    wg = weight.reshape(-1, g)
    max_val = wg.max(axis=1, keepdims=True)
    min_val = wg.min(axis=1, keepdims=True)
    scales = jnp.maximum(max_val - min_val, 1e-5) / max_int
    zeros = jnp.clip(-jnp.round(min_val / scales), 0, max_int)
    wq = ((jnp.clip(jnp.round(wg / scales) + zeros, 0, max_int) - zeros)
          * scales).reshape(nx, nf)
    y = x.reshape(-1, nx) @ wq + bias
    return y.reshape(*x.shape[:-1], nf)


if __name__ == "__main__":
    # Module config: nx=32 input features, nf=64 output features,
    # quant_args: n_bits_w=4, group_size=16  (AsymWeightQuantizer path).
    batch, seq, nx, nf = 2, 8, 32, 64
    n_bits_w, group_size = 4, 16

    key = jax.random.PRNGKey(0)
    kx, kw = jax.random.split(key)
    x = jax.random.normal(kx, (batch, seq, nx), dtype=jnp.float32)
    # Deterministic synthetic params (torch.empty is uninitialized; use normal).
    weight = 0.02 * jax.random.normal(kw, (nx, nf), dtype=jnp.float32)
    bias = 0.01 * jnp.arange(nf, dtype=jnp.float32)

    # Quantize once (cache at param load), then run the per-step matmul.
    wq = quantize_weight(weight, n_bits_w=n_bits_w, group_size=group_size)
    y = qconv1d_forward(x, wq, bias)
    y = jax.block_until_ready(y)

    y_ref = _reference(x, weight, bias, n_bits_w=n_bits_w,
                       group_size=group_size)
    # Tolerance loosened vs the f32 reference because the kernel matmul runs
    # bf16 operands (f32 accumulation); bf16 rounding << 4-bit quant error.
    np.testing.assert_allclose(np.asarray(y), np.asarray(y_ref),
                               rtol=2e-2, atol=2e-2)
    assert y.shape == (batch, seq, nf)
    print("KERNEL_OK")
</pallas_src>

<mosaic_0001>
module attributes {stable_mosaic.version = 11 : i64} {
  func.func @_quant_weight_kernel(%arg0: i32, %arg1: i32, %arg2: memref<32x64xf32, #tpu.memory_space<vmem>>, %arg3: memref<32x64xbf16, #tpu.memory_space<vmem>>) attributes {dimension_semantics = [#tpu.dimension_semantics<parallel>, #tpu.dimension_semantics<parallel>], iteration_bounds = array<i64: 1, 1>, scalar_prefetch = 0 : i64, scratch_operands = 0 : i64, tpu.core_type = #tpu.core_type<tc>, window_params = [{transform_indices = @transform_0, window_bounds = array<i64: 32, 64>}, {transform_indices = @transform_1, window_bounds = array<i64: 32, 64>}]} {
    %c0 = arith.constant 0 : index
    %c0_0 = arith.constant 0 : index
    %0 = vector.load %arg2[%c0, %c0_0] : memref<32x64xf32, #tpu.memory_space<vmem>>, vector<32x64xf32>
    %1 = vector.shape_cast %0 : vector<32x64xf32> to vector<32x4x16xf32>
    %cst = arith.constant dense<0xFF800000> : vector<32x4xf32>
    %2 = vector.multi_reduction <maximumf>, %1, %cst [2] : vector<32x4x16xf32> to vector<32x4xf32>
    %3 = vector.shape_cast %2 : vector<32x4xf32> to vector<32x4x1xf32>
    %cst_1 = arith.constant dense<0x7F800000> : vector<32x4xf32>
    %4 = vector.multi_reduction <minimumf>, %1, %cst_1 [2] : vector<32x4x16xf32> to vector<32x4xf32>
    %5 = vector.shape_cast %4 : vector<32x4xf32> to vector<32x4x1xf32>
    %6 = arith.subf %3, %5 : vector<32x4x1xf32>
    %cst_2 = arith.constant 9.99999974E-6 : f32
    %7 = vector.broadcast %cst_2 : f32 to vector<32x4x1xf32>
    %8 = arith.maximumf %6, %7 : vector<32x4x1xf32>
    %cst_3 = arith.constant 1.500000e+01 : f32
    %9 = vector.broadcast %cst_3 : f32 to vector<32x4x1xf32>
    %10 = arith.divf %8, %9 : vector<32x4x1xf32>
    %11 = arith.divf %5, %10 : vector<32x4x1xf32>
    %12 = math.roundeven %11 : vector<32x4x1xf32>
    %cst_4 = arith.constant 0.000000e+00 : f32
    %13 = vector.broadcast %cst_4 : f32 to vector<32x4x1xf32>
    %14 = arith.subf %13, %12 : vector<32x4x1xf32>
    %cst_5 = arith.constant 0.000000e+00 : f32
    %cst_6 = arith.constant 1.500000e+01 : f32
    %15 = vector.broadcast %cst_5 : f32 to vector<32x4x1xf32>
    %16 = arith.maximumf %15, %14 : vector<32x4x1xf32>
    %17 = vector.broadcast %cst_6 : f32 to vector<32x4x1xf32>
    %18 = arith.minimumf %17, %16 : vector<32x4x1xf32>
    %19 = vector.broadcast %10 : vector<32x4x1xf32> to vector<32x4x16xf32>
    %20 = arith.divf %1, %19 : vector<32x4x16xf32>
    %21 = math.roundeven %20 : vector<32x4x16xf32>
    %22 = vector.broadcast %18 : vector<32x4x1xf32> to vector<32x4x16xf32>
    %23 = arith.addf %21, %22 : vector<32x4x16xf32>
    %cst_7 = arith.constant 0.000000e+00 : f32
    %cst_8 = arith.constant 1.500000e+01 : f32
    %24 = vector.broadcast %cst_7 : f32 to vector<32x4x16xf32>
    %25 = arith.maximumf %24, %23 : vector<32x4x16xf32>
    %26 = vector.broadcast %cst_8 : f32 to vector<32x4x16xf32>
    %27 = arith.minimumf %26, %25 : vector<32x4x16xf32>
    %28 = vector.broadcast %18 : vector<32x4x1xf32> to vector<32x4x16xf32>
    %29 = arith.subf %27, %28 : vector<32x4x16xf32>
    %30 = vector.broadcast %10 : vector<32x4x1xf32> to vector<32x4x16xf32>
    %31 = arith.mulf %29, %30 : vector<32x4x16xf32>
    %32 = vector.shape_cast %31 : vector<32x4x16xf32> to vector<32x64xf32>
    %33 = arith.truncf %32 : vector<32x64xf32> to vector<32x64xbf16>
    %c0_9 = arith.constant 0 : index
    %c0_10 = arith.constant 0 : index
    %34 = vector.load %arg3[%c0_9, %c0_10] : memref<32x64xbf16, #tpu.memory_space<vmem>>, vector<32x64xbf16>
    tpu.vector_store %arg3[%c0_9, %c0_10], %33 {strides = array<i32>} : memref<32x64xbf16, #tpu.memory_space<vmem>>, vector<32x64xbf16>,
    return
  }
  func.func @transform_0(%arg0: i32, %arg1: i32) -> (i32, i32) {
    %c0_i32 = arith.constant 0 : i32
    return %arg0, %arg1 : i32, i32
  }
  func.func @transform_1(%arg0: i32, %arg1: i32) -> (i32, i32) {
    %c0_i32 = arith.constant 0 : i32
    return %arg0, %arg1 : i32, i32
  }
}

</mosaic_0001>

<bundles_post_ra>
// kernel: tpu_custom_call.1
= control target key start
LH: loop header
LB: loop body
LE: loop exit
PB: predicated region body
PF: predicated region fallthrough
CT: control target
= control target key end

     0   :  { %6 = vsyncpa [#allocation3], 0  ;;  %s2621_s0 = inlined_call_operand.hbm [shape: f32[32,64], index: 0, kind: input, shape index: {}]   ;;  %s2622_s1 = inlined_call_operand.hbm [shape: bf16[32,64], index: 1, kind: output, shape index: {}]  }
   0x1   :  { %7 = vsyncpa [#allocation4], 0  ;;  %s1647_s6 = smov [#allocation2]   ;;  %s1599_s10 = scalar_lea.hbm %s2621_s0, 512 }
   0x2   :  { %s13_s7 = sshll.u32 %s1647_s6, 4  ;;  %p1600_p0 = scmp.ne.s32.totalorder %s2621_s0, %s1599_s10  ;;  %s14_s7 = int_to_ptr.vmem [resolvable:$true] %s13_s7 }
   0x3   :  { %p1603_p1 = scmp.lt.u32.totalorder %s1599_s10, %s2621_s0 }
   0x5   :  { %p1605_p2 = pnand %p1603_p1, %p1600_p0 }
   0x7   :  { %1608 = shalt.err (!%p1605_p2)
}
   0x8   :  { %s1609_s15 = scalar_lea.vmem %s14_s7, 512  ;;  %p1614_p4 = scmp.lt.s32.totalorder %s14_s7, %s14_s7 }
   0x9   :  { %p1610_p3 = scmp.ne.s32.totalorder %s14_s7, %s1609_s15  ;;  %p1615_p5 = scmp.lt.s32.totalorder %s1609_s15, %s1609_s15 }
   0xb   :  { %p1616_p6 = por %p1615_p5, %p1614_p4 }
   0xd   :  { %p1617_p7 = pnand %p1616_p6, %p1610_p3 }
   0xf   :  { %1620 = shalt.err (!%p1617_p7)
}
  0x10   :  { %s1648_s16 = smov 128   ;;  %s1649_s17 = smov 8  }
  0x11   :  { %19 = dma.hbm_to_vmem [thread:$0]  %s2621_s0, 512, %s14_s7, [#allocation3], %s1648_s16, %s1648_s16, %s1649_s17  }
  0x12   :  { %1643 = dma.done.wait [#allocation3], 512  }
  0x13   :  { %1644 = vsyncadd [#allocation3], 4294966784  ;;  %v1684_v0 = vld [vmem:[#allocation2 + $0x10] sm:$0xff]  ;;  %v23_v1 = vld [vmem:[#allocation2] sm:$0xff]  ;;  %s1650_s20 = smov 112   ;;  %s1651_s21 = smov 96   ;;  %v72_v10 = vlaneseq }
  0x14   :  { %35 = vrot.lane.b32.xlu1 %v1684_v0, %s1650_s20  ;;  %31 = vrot.lane.b32.xlu0 %v23_v1, %s1650_s20  ;;  %v1687_v2 = vld [vmem:[#allocation2 + $0x18] sm:$0xff]  ;;  %v24_v3 = vld [vmem:[#allocation2 + $0x8] sm:$0xff]  ;;  %s1652_s0 = smov 80   ;;  %v1653_v8 = vmov 1983009808   ;;  %vm339_vm0 = vcmask 125952  }
  0x15   :  { %v70_v9 = vunpack.c.l.s4 %v1653_v8  ;;  %v73_v14 = vshrl.u32 %v72_v10, 7  ;;  %v1654_v17 = vmov 1934713408   ;;  %v1655_v56 = vmov 0.0   ;;  %s1656_s22 = smov 16   ;;  %s1657_s23 = smov 32  }
  0x16   :  { %v102_v18 = vunpack.c.l.s4 %v1654_v17  ;;  %s1658_s24 = smov 48   ;;  %vm1365_vm1 = vcmask 130048   ;;  %vm1370_vm2 = vcmask 261120   ;;  %vm1375_vm3 = vcmask 392192   ;;  %s1659_s25 = smov [#allocation5]  }
  0x17   :  { %v71_v13 = vunpack.c.0.s8 %v70_v9  ;;  %vm1396_vm4 = vcmask 519168   ;;  %s1406_s26 = sshll.u32 %s1659_s25, 4  ;;  %s1407_s26 = int_to_ptr.vmem [resolvable:$true] %s1406_s26 }
  0x18   :  { %37 = vrot.lane.b32.xlu1 %v1687_v2, %s1650_s20  ;;  %33 = vrot.lane.b32.xlu0 %v24_v3, %s1650_s20  ;;  %v103_v22 = vunpack.c.0.s8 %v102_v18  ;;  %s1621_s27 = scalar_lea.vmem %s1407_s26, 256  ;;  %p1626_p9 = scmp.lt.s32.totalorder %s1407_s26, %s1407_s26 }
  0x19   :  { %v1702_v19 = vsub.s32 %v71_v13, %v73_v14  ;;  %p1622_p8 = scmp.ne.s32.totalorder %s1407_s26, %s1621_s27  ;;  %p1627_p10 = scmp.lt.s32.totalorder %s1621_s27, %s1621_s27 }
  0x1a   :  { %v1708_v33 = vsub.s32 %v103_v22, %v73_v14 }
  0x1b   :  { %p1628_p11 = por %p1627_p10, %p1626_p9 }
  0x1c   :  { %45 = vrot.lane.b32.xlu1 %v24_v3, %s1651_s21  ;;  %43 = vrot.lane.b32.xlu0 %v23_v1, %s1651_s21  ;;  %2644 = vst [vmem:[#allocation8_spill] sm:$0xff] %v1708_v33 }
  0x1d   :  { %p1629_p12 = pnand %p1628_p11, %p1622_p8 }
  0x20   :  { %49 = vrot.lane.b32.xlu1 %v1687_v2, %s1651_s21  ;;  %47 = vrot.lane.b32.xlu0 %v1684_v0, %s1651_s21 }
  0x24   :  { %57 = vrot.lane.b32.xlu1 %v24_v3, %s1652_s0  ;;  %55 = vrot.lane.b32.xlu0 %v23_v1, %s1652_s0 }
  0x28   :  { %61 = vrot.lane.b32.xlu1 %v1687_v2, %s1652_s0  ;;  %59 = vrot.lane.b32.xlu0 %v1684_v0, %s1652_s0 }
  0x86   :  { %v1694_v4 = vpop.permute.xlu1 %35  ;;  %v32_v5 = vpop.permute.xlu0 %31 }
  0x8a   :  { %v1696_v6 = vpop.permute.xlu1 %37  ;;  %v34_v7 = vpop.permute.xlu0 %33 }
  0x8e   :  { %v46_v11 = vpop.permute.xlu1 %45  ;;  %v44_v12 = vpop.permute.xlu0 %43 }
  0x8f   :  { %v67_v20 = vcombine.low %v23_v1, %v44_v12  ;;  %v68_v21 = vcombine.high %v23_v1, %v44_v12  ;;  %v135_v25 = vcombine.low %v24_v3, %v46_v11  ;;  %v136_v42 = vcombine.high %v24_v3, %v46_v11 }
  0x91   :  { %v75_v31 = vrot.slane %v67_v20, %v1702_v19  ;;  %v82_v32 = vrot.slane %v68_v21, %v1702_v19  ;;  %v143_v34 = vrot.slane %v135_v25, %v1702_v19  ;;  %v150_v49 = vrot.slane %v136_v42, %v1702_v19 }
  0x92   :  { %v1698_v15 = vpop.permute.xlu1 %49  ;;  %v1700_v16 = vpop.permute.xlu0 %47 }
  0x93   :  { %v203_v1 = vcombine.low %v1684_v0, %v1700_v16  ;;  %v204_v21 = vcombine.high %v1684_v0, %v1700_v16  ;;  %v271_v16 = vcombine.low %v1687_v2, %v1698_v15 }
  0x95   :  { %v211_v11 = vrot.slane %v203_v1, %v1702_v19  ;;  %v218_v0 = vrot.slane %v204_v21, %v1702_v19 }
  0x96   :  { %v58_v23 = vpop.permute.xlu1 %57  ;;  %v56_v24 = vpop.permute.xlu0 %55 }
  0x97   :  { %v83_v26 = vcombine.low %v32_v5, %v56_v24  ;;  %v84_v27 = vcombine.high %v32_v5, %v56_v24  ;;  %v151_v28 = vcombine.low %v34_v7, %v58_v23  ;;  %v152_v43 = vcombine.high %v34_v7, %v58_v23 }
  0x99   :  { %v91_v29 = vrot.slane %v83_v26, %v1702_v19  ;;  %v98_v30 = vrot.slane %v84_v27, %v1702_v19  ;;  %v159_v35 = vrot.slane %v151_v28, %v1702_v19  ;;  %v166_v50 = vrot.slane %v152_v43, %v1702_v19 }
  0x9a   :  { %v60_v54 = vpop.permute.xlu0 %59  ;;  %v62_v25 = vpop.permute.xlu1 %61 }
  0x9b   :  { %v99_v36 = vcombine.low %v75_v31, %v91_v29  ;;  %v115_v37 = vcombine.low %v82_v32, %v98_v30  ;;  %v116_v38 = vcombine.high %v82_v32, %v98_v30  ;;  %v100_v39 = vcombine.high %v75_v31, %v91_v29 }
  0x9c   :  { %v167_v44 = vcombine.low %v143_v34, %v159_v35  ;;  %v168_v51 = vcombine.high %v143_v34, %v159_v35  ;;  %v183_v59 = vcombine.low %v150_v49, %v166_v50  ;;  %v219_v60 = vcombine.low %v1694_v4, %v60_v54 }
  0x9d   :  { %v1713_v40 = vrot.slane %v99_v36, %v1708_v33  ;;  %v1716_v41 = vrot.slane %v115_v37, %v1708_v33  ;;  %v1719_v45 = vrot.slane %v116_v38, %v1708_v33  ;;  %v1726_v48 = vrot.slane %v100_v39, %v1708_v33 }
  0x9e   :  { %v1731_v52 = vrot.slane %v167_v44, %v1708_v33  ;;  %v1742_v58 = vrot.slane %v168_v51, %v1708_v33  ;;  %v184_v3 = vcombine.high %v150_v49, %v166_v50  ;;  %v1756_v5 = vrot.slane %v183_v59, %v1708_v33 }
  0x9f   :  { %v352_v46 = vsel %vm339_vm0, %v1716_v41, -inf  ;;  %v340_v47 = vsel %vm339_vm0, %v1713_v40, -inf  ;;  %v358_v53 = vsel %vm339_vm0, %v1719_v45, -inf  ;;  %v346_v55 = vsel %vm339_vm0, %v1726_v48, -inf }
  0xa0   :  { %353 = vmax.xlane.f32.xlu1 %v352_v46  ;;  %341 = vmax.xlane.f32.xlu0 %v340_v47  ;;  %v1739_v57 = vcombine.high %v1726_v48, %v1655_v56  ;;  %v364_v61 = vsel %vm339_vm0, %v1731_v52, -inf  ;;  %v1751_v63 = vcombine.high %v1716_v41, %v1655_v56  ;;  %v227_v7 = vrot.slane %v219_v60, %v1702_v19 }
  0xa1   :  { %v370_v8 = vsel %vm339_vm0, %v1742_v58, -inf  ;;  %v1765_v10 = vcombine.high %v1719_v45, %v1655_v56  ;;  %v1769_v12 = vrot.slane %v184_v3, %v1708_v33  ;;  %v220_v13 = vcombine.high %v1694_v4, %v60_v54 }
  0xa2   :  { %v349_v62 = vsel %vm339_vm0, %v1739_v57, -inf  ;;  %v355_v9 = vsel %vm339_vm0, %v1751_v63, -inf  ;;  %v235_v14 = vcombine.low %v211_v11, %v227_v7  ;;  %v376_v17 = vsel %vm339_vm0, %v1756_v5, -inf }
  0xa3   :  { %v361_v18 = vsel %vm339_vm0, %v1765_v10, -inf  ;;  %v1778_v20 = vcombine.high %v1731_v52, %v1655_v56  ;;  %v234_v22 = vrot.slane %v220_v13, %v1702_v19  ;;  %v236_v23 = vcombine.high %v211_v11, %v227_v7 }
  0xa4   :  { %359 = vmax.xlane.f32.xlu1 %v358_v53  ;;  %347 = vmax.xlane.f32.xlu0 %v346_v55  ;;  %v1784_v4 = vrot.slane %v235_v14, %v1708_v33  ;;  %v382_v24 = vsel %vm339_vm0, %v1769_v12, -inf  ;;  %v1792_v27 = vcombine.high %v1742_v58, %v1655_v56  ;;  %v287_v28 = vcombine.low %v1696_v6, %v62_v25 }
  0xa5   :  { %v367_v26 = vsel %vm339_vm0, %v1778_v20, -inf  ;;  %v1799_v29 = vrot.slane %v236_v23, %v1708_v33  ;;  %v251_v30 = vcombine.low %v218_v0, %v234_v22  ;;  %v1807_v34 = vcombine.high %v1756_v5, %v1655_v56 }
  0xa6   :  { %2645 = vst [vmem:[#allocation9_spill] sm:$0xff] %v1784_v4  ;;  %2646 = vst [vmem:[#allocation10_spill] sm:$0xff] %v1792_v27  ;;  %v388_v31 = vsel %vm339_vm0, %v1784_v4, -inf  ;;  %v373_v32 = vsel %vm339_vm0, %v1792_v27, -inf  ;;  %v279_v35 = vrot.slane %v271_v16, %v1702_v19  ;;  %v295_v36 = vrot.slane %v287_v28, %v1702_v19 }
  0xa7   :  { %2647 = vst [vmem:[#allocation11_spill] sm:$0xff] %v1799_v29  ;;  %2648 = vst [vmem:[#allocation12_spill] sm:$0xff] %v1807_v34  ;;  %v252_v37 = vcombine.high %v218_v0, %v234_v22  ;;  %v1812_v38 = vrot.slane %v251_v30, %v1708_v33  ;;  %v394_v39 = vsel %vm339_vm0, %v1799_v29, -inf  ;;  %v379_v42 = vsel %vm339_vm0, %v1807_v34, -inf }
  0xa8   :  { %365 = vmax.xlane.f32.xlu1 %v364_v61  ;;  %350 = vmax.xlane.f32.xlu0 %v349_v62  ;;  %v1820_v43 = vcombine.high %v1769_v12, %v1655_v56  ;;  %v272_v44 = vcombine.high %v1687_v2, %v1698_v15  ;;  %v288_v46 = vcombine.high %v1696_v6, %v62_v25  ;;  %v442_v28 = vsel %vm339_vm0, %v1726_v48, inf }
  0xa9   :  { %2649 = vst [vmem:[#allocation13_spill] sm:$0xff] %v1812_v38  ;;  %v303_v47 = vcombine.low %v279_v35, %v295_v36  ;;  %v1826_v49 = vrot.slane %v252_v37, %v1708_v33  ;;  %v400_v50 = vsel %vm339_vm0, %v1812_v38, -inf  ;;  %v1834_v53 = vcombine.high %v1784_v4, %v1655_v56 }
  0xaa   :  { %2650 = vst [vmem:[#allocation14_spill] sm:$0xff] %v1820_v43  ;;  %v385_v51 = vsel %vm339_vm0, %v1820_v43, -inf  ;;  %v286_v2 = vrot.slane %v272_v44, %v1702_v19  ;;  %v302_v6 = vrot.slane %v288_v46, %v1702_v19  ;;  %v304_v15 = vcombine.high %v279_v35, %v295_v36 }
  0xab   :  { %2651 = vst [vmem:[#allocation15_spill] sm:$0xff] %v1826_v49  ;;  %2652 = vst [vmem:[#allocation16_spill] sm:$0xff] %v1834_v53  ;;  %v1839_v54 = vrot.slane %v303_v47, %v1708_v33  ;;  %v406_v55 = vsel %vm339_vm0, %v1826_v49, -inf  ;;  %v391_v59 = vsel %vm339_vm0, %v1834_v53, -inf  ;;  %v1847_v60 = vcombine.high %v1799_v29, %v1655_v56 }
  0xac   :  { %371 = vmax.xlane.f32.xlu1 %v370_v8  ;;  %356 = vmax.xlane.f32.xlu0 %v355_v9  ;;  %v1850_v61 = vrot.slane %v304_v15, %v1708_v33  ;;  %v319_v62 = vcombine.low %v286_v2, %v302_v6  ;;  %v1858_v7 = vcombine.high %v1812_v38, %v1655_v56  ;;  %v454_v37 = vsel %vm339_vm0, %v1719_v45, inf }
  0xad   :  { %2653 = vst [vmem:[#allocation17_spill] sm:$0xff] %v1839_v54  ;;  %2654 = vst [vmem:[#allocation18_spill] sm:$0xff] %v1847_v60  ;;  %v412_v1 = vsel %vm339_vm0, %v1839_v54, -inf  ;;  %v397_v3 = vsel %vm339_vm0, %v1847_v60, -inf  ;;  %v320_v8 = vcombine.high %v286_v2, %v302_v6  ;;  %v1869_v14 = vcombine.high %v1826_v49, %v1655_v56 }
  0xae   :  { %2655 = vst [vmem:[#allocation19_spill] sm:$0xff] %v1850_v61  ;;  %2656 = vst [vmem:[#allocation20_spill] sm:$0xff] %v1858_v7  ;;  %v1861_v9 = vrot.slane %v319_v62, %v1708_v33  ;;  %v418_v11 = vsel %vm339_vm0, %v1850_v61, -inf  ;;  %v403_v13 = vsel %vm339_vm0, %v1858_v7, -inf  ;;  %v1880_v22 = vcombine.high %v1839_v54, %v1655_v56 }
  0xaf   :  { %2658 = vst [vmem:[#allocation22_spill] sm:$0xff] %v1869_v14  ;;  %v409_v21 = vsel %vm339_vm0, %v1869_v14, -inf  ;;  %v1888_v25 = vcombine.high %v1850_v61, %v1655_v56  ;;  %v1912_v36 = vcombine.high %v1713_v40, %v1655_v56  ;;  %v445_v44 = vsel %vm339_vm0, %v1739_v57, inf }
  0xb0   :  { %377 = vmax.xlane.f32.xlu1 %v376_v17  ;;  %362 = vmax.xlane.f32.xlu0 %v361_v18  ;;  %2657 = vst [vmem:[#allocation21_spill] sm:$0xff] %v1861_v9  ;;  %v1872_v17 = vrot.slane %v320_v8, %v1708_v33  ;;  %v424_v18 = vsel %vm339_vm0, %v1861_v9, -inf  ;;  %2660 = vst [vmem:[#allocation24_spill] sm:$0xff] %v1880_v22  ;;  %v1896_v16 = vcombine.high %v1861_v9, %v1655_v56 }
  0xb1   :  { %2661 = vst [vmem:[#allocation25_spill] sm:$0xff] %v1888_v25  ;;  %v421_v0 = vsel %vm339_vm0, %v1888_v25, -inf  ;;  %v451_v46 = vsel %vm339_vm0, %v1751_v63, inf  ;;  %v466_v47 = vsel %vm339_vm0, %v1742_v58, inf  ;;  %v463_v2 = vsel %vm339_vm0, %v1778_v20, inf }
  0xb2   :  { %2659 = vst [vmem:[#allocation23_spill] sm:$0xff] %v1872_v17  ;;  %v430_v23 = vsel %vm339_vm0, %v1872_v17, -inf  ;;  %2662 = vst [vmem:[#allocation26_spill] sm:$0xff] %v1896_v16  ;;  %v427_v30 = vsel %vm339_vm0, %v1896_v16, -inf  ;;  %v478_v6 = vsel %vm339_vm0, %v1769_v12, inf  ;;  %v469_v15 = vsel %vm339_vm0, %v1792_v27, inf }
  0xb3   :  { %v490_v62 = vsel %vm339_vm0, %v1799_v29, inf  ;;  %v487_v8 = vsel %vm339_vm0, %v1834_v53, inf }
  0xb4   :  { %383 = vmax.xlane.f32.xlu1 %v382_v24  ;;  %368 = vmax.xlane.f32.xlu0 %v367_v26  ;;  %v415_v24 = vsel %vm339_vm0, %v1880_v22, -inf  ;;  %v436_v26 = vsel %vm339_vm0, %v1713_v40, inf }
  0xb8   :  { %389 = vmax.xlane.f32.xlu1 %v388_v31  ;;  %374 = vmax.xlane.f32.xlu0 %v373_v32  ;;  %v1904_v31 = vcombine.high %v1872_v17, %v1655_v56  ;;  %v448_v32 = vsel %vm339_vm0, %v1716_v41, inf  ;;  %v343_v56 = vsel %vm339_vm0, %v1912_v36, -inf }
  0xba   :  { %2663 = vst [vmem:[#allocation27_spill] sm:$0xff] %v1904_v31  ;;  %v433_v35 = vsel %vm339_vm0, %v1904_v31, -inf }
  0xbc   :  { %395 = vmax.xlane.f32.xlu1 %v394_v39  ;;  %380 = vmax.xlane.f32.xlu0 %v379_v42  ;;  %v439_v39 = vsel %vm339_vm0, %v1912_v36, inf  ;;  %v460_v42 = vsel %vm339_vm0, %v1731_v52, inf }
  0xc0   :  { %401 = vmax.xlane.f32.xlu1 %v400_v50  ;;  %386 = vmax.xlane.f32.xlu0 %v385_v51  ;;  %v457_v50 = vsel %vm339_vm0, %v1765_v10, inf  ;;  %v472_v51 = vsel %vm339_vm0, %v1756_v5, inf }
  0xc4   :  { %407 = vmax.xlane.f32.xlu1 %v406_v55  ;;  %392 = vmax.xlane.f32.xlu0 %v391_v59  ;;  %v484_v55 = vsel %vm339_vm0, %v1784_v4, inf  ;;  %v475_v59 = vsel %vm339_vm0, %v1807_v34, inf }
  0xc8   :  { %413 = vmax.xlane.f32.xlu1 %v412_v1  ;;  %398 = vmax.xlane.f32.xlu0 %v397_v3  ;;  %v481_v1 = vsel %vm339_vm0, %v1820_v43, inf  ;;  %v496_v3 = vsel %vm339_vm0, %v1812_v38, inf }
  0xcc   :  { %419 = vmax.xlane.f32.xlu1 %v418_v11  ;;  %404 = vmax.xlane.f32.xlu0 %v403_v13  ;;  %v502_v11 = vsel %vm339_vm0, %v1826_v49, inf  ;;  %v493_v13 = vsel %vm339_vm0, %v1847_v60, inf }
  0xd0   :  { %425 = vmax.xlane.f32.xlu1 %v424_v18  ;;  %410 = vmax.xlane.f32.xlu0 %v409_v21  ;;  %v508_v18 = vsel %vm339_vm0, %v1839_v54, inf  ;;  %v499_v21 = vsel %vm339_vm0, %v1858_v7, inf }
  0xd4   :  { %431 = vmax.xlane.f32.xlu1 %v430_v23  ;;  %416 = vmax.xlane.f32.xlu0 %v415_v24  ;;  %v514_v23 = vsel %vm339_vm0, %v1850_v61, inf  ;;  %v505_v24 = vsel %vm339_vm0, %v1869_v14, inf }
  0xd8   :  { %437 = vmin.xlane.f32.xlu1 %v436_v26  ;;  %422 = vmax.xlane.f32.xlu0 %v421_v0  ;;  %v520_v26 = vsel %vm339_vm0, %v1861_v9, inf  ;;  %v511_v0 = vsel %vm339_vm0, %v1880_v22, inf }
  0xdc   :  { %443 = vmin.xlane.f32.xlu1 %v442_v28  ;;  %428 = vmax.xlane.f32.xlu0 %v427_v30  ;;  %v526_v28 = vsel %vm339_vm0, %v1872_v17, inf  ;;  %v517_v30 = vsel %vm339_vm0, %v1888_v25, inf }
  0xe0   :  { %449 = vmin.xlane.f32.xlu1 %v448_v32  ;;  %434 = vmax.xlane.f32.xlu0 %v433_v35  ;;  %v523_v32 = vsel %vm339_vm0, %v1896_v16, inf  ;;  %v529_v35 = vsel %vm339_vm0, %v1904_v31, inf }
  0xe4   :  { %455 = vmin.xlane.f32.xlu1 %v454_v37  ;;  %440 = vmin.xlane.f32.xlu0 %v439_v39 }
  0xe8   :  { %461 = vmin.xlane.f32.xlu1 %v460_v42  ;;  %446 = vmin.xlane.f32.xlu0 %v445_v44 }
  0xec   :  { %344 = vmax.xlane.f32.xlu1 %v343_v56  ;;  %452 = vmin.xlane.f32.xlu0 %v451_v46 }
  0xf0   :  { %467 = vmin.xlane.f32.xlu1 %v466_v47  ;;  %458 = vmin.xlane.f32.xlu0 %v457_v50 }
  0xf4   :  { %473 = vmin.xlane.f32.xlu1 %v472_v51  ;;  %464 = vmin.xlane.f32.xlu0 %v463_v2 }
  0xf8   :  { %479 = vmin.xlane.f32.xlu1 %v478_v6  ;;  %470 = vmin.xlane.f32.xlu0 %v469_v15 }
  0xfc   :  { %485 = vmin.xlane.f32.xlu1 %v484_v55  ;;  %476 = vmin.xlane.f32.xlu0 %v475_v59 }
 0x100   :  { %491 = vmin.xlane.f32.xlu1 %v490_v62  ;;  %482 = vmin.xlane.f32.xlu0 %v481_v1 }
 0x104   :  { %497 = vmin.xlane.f32.xlu1 %v496_v3  ;;  %488 = vmin.xlane.f32.xlu0 %v487_v8 }
 0x108   :  { %503 = vmin.xlane.f32.xlu1 %v502_v11  ;;  %494 = vmin.xlane.f32.xlu0 %v493_v13 }
 0x10c   :  { %509 = vmin.xlane.f32.xlu1 %v508_v18  ;;  %500 = vmin.xlane.f32.xlu0 %v499_v21 }
 0x110   :  { %515 = vmin.xlane.f32.xlu1 %v514_v23  ;;  %506 = vmin.xlane.f32.xlu0 %v505_v24 }
 0x114   :  { %521 = vmin.xlane.f32.xlu1 %v520_v26  ;;  %512 = vmin.xlane.f32.xlu0 %v511_v0 }
 0x118   :  { %527 = vmin.xlane.f32.xlu1 %v526_v28  ;;  %518 = vmin.xlane.f32.xlu0 %v517_v30 }
 0x11c   :  { %524 = vmin.xlane.f32.xlu0 %v523_v32 }
 0x120   :  { %530 = vmin.xlane.f32.xlu0 %v529_v35 }
 0x12d   :  { %v354_v37 = vpop.xlane.xlu1 %353  ;;  %v342_v39 = vpop.xlane.xlu0 %341 }
 0x131   :  { %v360_v42 = vpop.xlane.xlu1 %359  ;;  %v348_v44 = vpop.xlane.xlu0 %347 }
 0x135   :  { %v366_v56 = vpop.xlane.xlu1 %365  ;;  %v351_v46 = vpop.xlane.xlu0 %350 }
 0x139   :  { %v1974_v47 = vpop.xlane.xlu1 %371  ;;  %v1976_v50 = vpop.xlane.xlu0 %356 }
 0x13d   :  { %v1978_v51 = vpop.xlane.xlu1 %377  ;;  %v1980_v2 = vpop.xlane.xlu0 %362 }
 0x141   :  { %v1982_v6 = vpop.xlane.xlu1 %383  ;;  %v1984_v15 = vpop.xlane.xlu0 %368 }
 0x145   :  { %v1986_v55 = vpop.xlane.xlu1 %389  ;;  %v1988_v59 = vpop.xlane.xlu0 %374 }
 0x149   :  { %v1990_v62 = vpop.xlane.xlu1 %395  ;;  %v1992_v1 = vpop.xlane.xlu0 %380 }
 0x14d   :  { %v1994_v3 = vpop.xlane.xlu1 %401  ;;  %v1996_v8 = vpop.xlane.xlu0 %386 }
 0x151   :  { %v1998_v11 = vpop.xlane.xlu1 %407  ;;  %v2000_v13 = vpop.xlane.xlu0 %392 }
 0x155   :  { %v2002_v18 = vpop.xlane.xlu1 %413  ;;  %v2004_v21 = vpop.xlane.xlu0 %398 }
 0x156   :  { %2664 = vst [vmem:[#allocation28_spill] sm:$0xff] %v2002_v18 }
 0x159   :  { %v2006_v23 = vpop.xlane.xlu1 %419  ;;  %v2008_v24 = vpop.xlane.xlu0 %404 }
 0x15a   :  { %2665 = vst [vmem:[#allocation29_spill] sm:$0xff] %v2006_v23  ;;  %2666 = vst [vmem:[#allocation30_spill] sm:$0xff] %v2008_v24 }
 0x15d   :  { %v2010_v26 = vpop.xlane.xlu1 %425  ;;  %v2012_v0 = vpop.xlane.xlu0 %410 }
 0x15e   :  { %2667 = vst [vmem:[#allocation31_spill] sm:$0xff] %v2010_v26  ;;  %2668 = vst [vmem:[#allocation32_spill] sm:$0xff] %v2012_v0 }
 0x161   :  { %v2014_v28 = vpop.xlane.xlu1 %431  ;;  %v2016_v30 = vpop.xlane.xlu0 %416 }
 0x162   :  { %2669 = vst [vmem:[#allocation33_spill] sm:$0xff] %v2014_v28  ;;  %2670 = vst [vmem:[#allocation34_spill] sm:$0xff] %v2016_v30 }
 0x165   :  { %v438_v32 = vpop.xlane.xlu1 %437  ;;  %v2018_v31 = vpop.xlane.xlu0 %422 }
 0x166   :  { %v532_v35 = vsub.f32 %v342_v39, %v438_v32  ;;  %2671 = vst [vmem:[#allocation35_spill] sm:$0xff] %v2018_v31 }
 0x168   :  { %v564_v16 = vmax.f32 %v532_v35, 1e-05 }
 0x169   :  { %v444_v25 = vpop.xlane.xlu1 %443  ;;  %v2022_v9 = vpop.xlane.xlu0 %428 }
 0x16a   :  { %v2020_v33 = vmul.f32 0.06666667, %v564_v16  ;;  %v534_v17 = vsub.f32 %v348_v44, %v444_v25  ;;  %2672 = vst [vmem:[#allocation36_spill] sm:$0xff] %v2022_v9 }
 0x16c   :  { %1535 = vrcp.f32 %v2020_v33  ;;  %v566_v22 = vmax.f32 %v534_v17, 1e-05 }
 0x16d   :  { %v450_v14 = vpop.xlane.xlu1 %449  ;;  %v2027_v7 = vpop.xlane.xlu0 %434 }
 0x16e   :  { %v2025_v61 = vmul.f32 0.06666667, %v566_v22  ;;  %v536_v54 = vsub.f32 %v354_v37, %v450_v14  ;;  %2673 = vst [vmem:[#allocation37_spill] sm:$0xff] %v2027_v7 }
 0x170   :  { %1537 = vrcp.f32 %v2025_v61  ;;  %v568_v39 = vmax.f32 %v536_v54, 1e-05 }
 0x171   :  { %v456_v31 = vpop.xlane.xlu1 %455  ;;  %v2032_v28 = vpop.xlane.xlu0 %440 }
 0x172   :  { %v2030_v35 = vmul.f32 0.06666667, %v568_v39  ;;  %v538_v16 = vsub.f32 %v360_v42, %v456_v31 }
 0x174   :  { %1539 = vrcp.f32 %v2030_v35  ;;  %v570_v44 = vmax.f32 %v538_v16, 1e-05 }
 0x175   :  { %v2035_v9 = vpop.xlane.xlu1 %461  ;;  %v2040_v7 = vpop.xlane.xlu0 %446 }
 0x176   :  { %v1536_v17 = vpop.eup %1535  ;;  %v2037_v22 = vmul.f32 0.06666667, %v570_v44  ;;  %v540_v37 = vsub.f32 %v366_v56, %v2035_v9  ;;  %v535_v54 = vsub.f32 %v351_v46, %v2040_v7 }
 0x177   :  { %v630_v30 = vmul.f32 %v1536_v17, %v438_v32  ;;  %v821_v16 = vmul.f32 %v1536_v17, %v1713_v40 }
 0x178   :  { %1541 = vrcp.f32 %v2037_v22  ;;  %v572_v42 = vmax.f32 %v540_v37, 1e-05  ;;  %v567_v26 = vmax.f32 %v535_v54, 1e-05 }
 0x179   :  { %v1426_v39 = vround.rtne.f32 %v630_v30  ;;  %v345_v0 = vpop.xlane.xlu1 %344  ;;  %v2048_v49 = vpop.xlane.xlu0 %452 }
 0x17a   :  { %v1538_v23 = vpop.eup %1537  ;;  %v2045_v60 = vmul.f32 0.06666667, %v572_v42  ;;  %v533_v44 = vsub.f32 %v345_v0, %v2032_v28  ;;  %v2051_v46 = vmul.f32 0.06666667, %v567_v26  ;;  %v537_v37 = vsub.f32 %v1976_v50, %v2048_v49 }
 0x17b   :  { %v725_v56 = vsub.f32 0.0, %v1426_v39  ;;  %v634_v53 = vmul.f32 %v1538_v23, %v444_v25  ;;  %v823_v32 = vmul.f32 %v1538_v23, %v1726_v48  ;;  %v1458_v42 = vround.rtne.f32 %v821_v16 }
 0x17c   :  { %1543 = vrcp.f32 %v2045_v60  ;;  %v565_v30 = vmax.f32 %v533_v44, 1e-05  ;;  %v569_v25 = vmax.f32 %v537_v37, 1e-05 }
 0x17d   :  { %v757_v54 = vmax.f32 %v725_v56, 0.0  ;;  %v1428_v40 = vround.rtne.f32 %v634_v53  ;;  %1545 = vrcp.f32 %v2051_v46  ;;  %v2057_v17 = vpop.xlane.xlu1 %467  ;;  %v2063_v23 = vpop.xlane.xlu0 %458  ;;  %v1460_v38 = vround.rtne.f32 %v823_v32 }
 0x17e   :  { %v1540_v0 = vpop.eup %1539  ;;  %v2059_v39 = vmul.f32 0.06666667, %v565_v30  ;;  %v542_v48 = vsub.f32 %v1974_v47, %v2057_v17  ;;  %v2066_v53 = vmul.f32 0.06666667, %v569_v25  ;;  %v539_v16 = vsub.f32 %v1980_v2, %v2063_v23 }
 0x17f   :  { %v789_v26 = vmin.f32 %v757_v54, 15.0  ;;  %v727_v44 = vsub.f32 0.0, %v1428_v40  ;;  %v638_v50 = vmul.f32 %v1540_v0, %v450_v14  ;;  %v825_v18 = vmul.f32 %v1540_v0, %v1716_v41 }
 0x180   :  { %1547 = vrcp.f32 %v2059_v39  ;;  %v574_v56 = vmax.f32 %v542_v48, 1e-05  ;;  %v571_v14 = vmax.f32 %v539_v16, 1e-05 }
 0x181   :  { %v885_v30 = vadd.f32 %v1458_v42, %v789_v26  ;;  %v759_v24 = vmax.f32 %v727_v44, 0.0  ;;  %v1430_v37 = vround.rtne.f32 %v638_v50  ;;  %v2071_v47 = vpop.xlane.xlu1 %473  ;;  %1549 = vrcp.f32 %v2066_v53 }
 0x182   :  { %v1542_v43 = vpop.eup %1541  ;;  %v2074_v32 = vmul.f32 0.06666667, %v574_v56  ;;  %v544_v54 = vsub.f32 %v1978_v51, %v2071_v47  ;;  %v2079_v44 = vmul.f32 0.06666667, %v571_v14  ;;  %v1462_v56 = vround.rtne.f32 %v825_v18 }
 0x183   :  { %v917_v40 = vmax.f32 %v885_v30, 0.0  ;;  %v791_v25 = vmin.f32 %v759_v24, 15.0  ;;  %v729_v48 = vsub.f32 0.0, %v1430_v37  ;;  %v642_v2 = vmul.f32 %v1542_v43, %v456_v31 }
 0x184   :  { %v827_v42 = vmul.f32 %v1542_v43, %v1719_v45  ;;  %v576_v41 = vmax.f32 %v544_v54, 1e-05  ;;  %1551 = vrcp.f32 %v2074_v32 }
 0x185   :  { %v949_v0 = vmin.f32 %v917_v40, 15.0  ;;  %v887_v50 = vadd.f32 %v1460_v38, %v791_v25  ;;  %v761_v29 = vmax.f32 %v729_v48, 0.0  ;;  %v1432_v34 = vround.rtne.f32 %v642_v2 }
 0x186   :  { %v1544_v4 = vpop.eup %1543  ;;  %1553 = vrcp.f32 %v2079_v44  ;;  %v1464_v24 = vround.rtne.f32 %v827_v42  ;;  %v2085_v54 = vmul.f32 0.06666667, %v576_v41 }
 0x187   :  { %v1546_v16 = vpop.eup %1545  ;;  %v919_v27 = vmax.f32 %v887_v50, 0.0  ;;  %v793_v51 = vmin.f32 %v761_v29, 15.0  ;;  %v731_v30 = vsub.f32 0.0, %v1432_v34  ;;  %v981_v31 = vsub.f32 %v949_v0, %v789_v26 }
 0x188   :  { %v646_v45 = vmul.f32 %v1544_v4, %v2035_v9  ;;  %v636_v43 = vmul.f32 %v1546_v16, %v2040_v7  ;;  %v829_v48 = vmul.f32 %v1544_v4, %v1731_v52  ;;  %v824_v29 = vmul.f32 %v1546_v16, %v1739_v57  ;;  %v2097_v57 = vpop.xlane.xlu0 %464 }
 0x189   :  { %v951_v37 = vmin.f32 %v919_v27, 15.0  ;;  %v889_v38 = vadd.f32 %v1462_v56, %v793_v51  ;;  %v763_v14 = vmax.f32 %v731_v30, 0.0  ;;  %v2091_v7 = vmul.f32 %v981_v31, %v2020_v33 }
 0x18a   :  { %v1548_v18 = vpop.eup %1547  ;;  %v1434_v40 = vround.rtne.f32 %v646_v45  ;;  %v1429_v2 = vround.rtne.f32 %v636_v43  ;;  %1555 = vrcp.f32 %v2085_v54 }
 0x18b   :  { %v983_v34 = vsub.f32 %v951_v37, %v791_v25  ;;  %v921_v50 = vmax.f32 %v889_v38, 0.0  ;;  %v795_v26 = vmin.f32 %v763_v14, 15.0  ;;  %v632_v42 = vmul.f32 %v1548_v18, %v2032_v28  ;;  %v1550_v9 = vpop.eup %1549 }
 0x18c   :  { %v733_v27 = vsub.f32 0.0, %v1434_v40  ;;  %v728_v0 = vsub.f32 0.0, %v1429_v2  ;;  %v822_v41 = vmul.f32 %v1548_v18, %v1912_v36  ;;  %v640_v28 = vmul.f32 %v1550_v9, %v2048_v49  ;;  %v2106_v49 = vpop.xlane.xlu1 %479 }
 0x18d   :  { %v2095_v56 = vmul.f32 %v983_v34, %v2025_v61  ;;  %v953_v52 = vmin.f32 %v921_v50, 15.0  ;;  %v891_v4 = vadd.f32 %v1464_v24, %v795_v26  ;;  %v1427_v30 = vround.rtne.f32 %v632_v42 }
 0x18e   :  { %v765_v25 = vmax.f32 %v733_v27, 0.0  ;;  %v760_v16 = vmax.f32 %v728_v0, 0.0  ;;  %v1552_v43 = vpop.eup %1551  ;;  %v1461_v24 = vround.rtne.f32 %v824_v29  ;;  %v1431_v38 = vround.rtne.f32 %v640_v28  ;;  %v2112_v29 = vpop.xlane.xlu0 %470 }
 0x18f   :  { %v1045_v33 = vcombine.low %v2091_v7, %v2095_v56  ;;  %v985_v31 = vsub.f32 %v953_v52, %v793_v51  ;;  %v923_v45 = vmax.f32 %v891_v4, 0.0  ;;  %v726_v36 = vsub.f32 0.0, %v1427_v30 }
 0x190   :  { %v2103_v61 = vmin.f32 %v765_v25, 15.0  ;;  %v792_v37 = vmin.f32 %v760_v16, 15.0  ;;  %v1554_v14 = vpop.eup %1553  ;;  %v826_v2 = vmul.f32 %v1550_v9, %v1751_v63  ;;  %v1466_v34 = vround.rtne.f32 %v829_v48 }
 0x191   :  { %v955_v18 = vmin.f32 %v923_v45, 15.0  ;;  %v758_v40 = vmax.f32 %v726_v36, 0.0  ;;  %v1459_v42 = vround.rtne.f32 %v822_v41  ;;  %v730_v27 = vsub.f32 0.0, %v1431_v38 }
 0x192   :  { %v888_v50 = vadd.f32 %v1461_v24, %v792_v37  ;;  %v2109_v51 = vmul.f32 %v985_v31, %v2030_v35  ;;  %v650_v4 = vmul.f32 %v1552_v43, %v2057_v17  ;;  %v893_v30 = vadd.f32 %v1466_v34, %v2103_v61 }
 0x193   :  { %v987_v0 = vsub.f32 %v955_v18, %v795_v26  ;;  %v790_v52 = vmin.f32 %v758_v40, 15.0  ;;  %v762_v16 = vmax.f32 %v730_v27, 0.0  ;;  %v644_v63 = vmul.f32 %v1554_v14, %v2063_v23  ;;  %v2125_v23 = vpop.xlane.xlu1 %485 }
 0x194   :  { %v920_v25 = vmax.f32 %v888_v50, 0.0  ;;  %v1463_v41 = vround.rtne.f32 %v826_v2  ;;  %v1436_v28 = vround.rtne.f32 %v650_v4  ;;  %v831_v26 = vmul.f32 %v1552_v43, %v1742_v58  ;;  %v2130_v43 = vpop.xlane.xlu0 %476 }
 0x195   :  { %v2117_v48 = vmul.f32 %v987_v0, %v2037_v22  ;;  %v886_v9 = vadd.f32 %v1459_v42, %v790_v52  ;;  %v2119_v31 = vmin.f32 %v762_v16, 15.0  ;;  %v1433_v17 = vround.rtne.f32 %v644_v63  ;;  %v1556_v22 = vpop.eup %1555 }
 0x196   :  { %v952_v35 = vmin.f32 %v920_v25, 15.0  ;;  %v735_v24 = vsub.f32 0.0, %v1436_v28  ;;  %v828_v38 = vmul.f32 %v1554_v14, %v1765_v10  ;;  %v541_v34 = vsub.f32 %v1984_v15, %v2097_v57 }
 0x197   :  { %v1061_v45 = vcombine.low %v2109_v51, %v2117_v48  ;;  %v918_v36 = vmax.f32 %v886_v9, 0.0  ;;  %v890_v40 = vadd.f32 %v1463_v41, %v2119_v31  ;;  %v732_v2 = vsub.f32 0.0, %v1433_v17 }
 0x198   :  { %v984_v18 = vsub.f32 %v952_v35, %v792_v37  ;;  %v767_v58 = vmax.f32 %v735_v24, 0.0  ;;  %v925_v42 = vmax.f32 %v893_v30, 0.0  ;;  %v1468_v0 = vround.rtne.f32 %v831_v26  ;;  %v2140_v26 = vpop.xlane.xlu1 %491 }
 0x199   :  { %v950_v50 = vmin.f32 %v918_v36, 15.0  ;;  %v922_v27 = vmax.f32 %v890_v40, 0.0  ;;  %v764_v4 = vmax.f32 %v732_v2, 0.0  ;;  %v1465_v14 = vround.rtne.f32 %v828_v38  ;;  %v2152_v38 = vpop.xlane.xlu0 %482 }
 0x19a   :  { %v2132_v10 = vmin.f32 %v767_v58, 15.0  ;;  %v654_v37 = vmul.f32 %v1556_v22, %v2071_v47  ;;  %v1016_v16 = vmul.f32 %v984_v18, %v2051_v46  ;;  %v573_v9 = vmax.f32 %v541_v34, 1e-05 }
 0x19b   :  { %v982_v25 = vsub.f32 %v950_v50, %v790_v52  ;;  %v796_v63 = vmin.f32 %v764_v4, 15.0  ;;  %v546_v15 = vsub.f32 %v1982_v6, %v2106_v49  ;;  %v954_v28 = vmin.f32 %v922_v27, 15.0 }
 0x19c   :  { %v895_v30 = vadd.f32 %v1468_v0, %v2132_v10  ;;  %v1438_v35 = vround.rtne.f32 %v654_v37  ;;  %v2146_v47 = vrot.slane %v1045_v33, %v1702_v19  ;;  %v2148_v52 = vmul.f32 0.06666667, %v573_v9  ;;  %v2171_v4 = vpop.xlane.xlu1 %497 }
 0x19d   :  { %v1014_v41 = vmul.f32 %v982_v25, %v2059_v39  ;;  %v892_v46 = vadd.f32 %v1465_v14, %v796_v63  ;;  %v578_v17 = vmax.f32 %v546_v15, 1e-05  ;;  %v543_v39 = vsub.f32 %v1988_v59, %v2112_v29 }
 0x19e   :  { %v927_v6 = vmax.f32 %v895_v30, 0.0  ;;  %v737_v24 = vsub.f32 0.0, %v1438_v35  ;;  %v957_v18 = vmin.f32 %v925_v42, 15.0  ;;  %1557 = vrcp.f32 %v2148_v52 }
 0x19f   :  { %v1053_v36 = vcombine.low %v1014_v41, %v1016_v16  ;;  %v924_v40 = vmax.f32 %v892_v46, 0.0  ;;  %v2155_v2 = vmul.f32 0.06666667, %v578_v17  ;;  %v986_v56 = vsub.f32 %v954_v28, %v2119_v31  ;;  %v2184_v41 = vpop.xlane.xlu0 %488 }
 0x1a0   :  { %v769_v33 = vmax.f32 %v737_v24, 0.0  ;;  %v575_v34 = vmax.f32 %v543_v39, 1e-05  ;;  %v548_v59 = vsub.f32 %v1986_v55, %v2125_v23  ;;  %v545_v58 = vsub.f32 %v1992_v1, %v2130_v43 }
 0x1a1   :  { %v2158_v7 = vrot.slane %v1053_v36, %v1702_v19  ;;  %v956_v50 = vmin.f32 %v924_v40, 15.0  ;;  %1559 = vrcp.f32 %v2155_v2  ;;  %v959_v0 = vmin.f32 %v927_v6, 15.0  ;;  %v2207_v36 = vpop.xlane.xlu1 %503 }
 0x1a2   :  { %v833_v31 = vmul.f32 %v1556_v22, %v1756_v5  ;;  %v2173_v14 = vmul.f32 0.06666667, %v575_v34  ;;  %v580_v37 = vmax.f32 %v548_v59, 1e-05  ;;  %v577_v16 = vmax.f32 %v545_v58, 1e-05 }
 0x1a3   :  { %v1077_v42 = vcombine.low %v2146_v47, %v2158_v7  ;;  %v988_v25 = vsub.f32 %v956_v50, %v796_v63  ;;  %v2176_v55 = vmul.f32 %v986_v56, %v2066_v53  ;;  %v2178_v1 = vmin.f32 %v769_v33, 15.0 }
 0x1a4   :  { %v550_v9 = vsub.f32 %v1990_v62, %v2140_v26  ;;  %v547_v15 = vsub.f32 %v1996_v8, %v2152_v38  ;;  %1561 = vrcp.f32 %v2173_v14  ;;  %v2190_v22 = vmul.f32 0.06666667, %v580_v37 }
 0x1a5   :  { %v2187_v5 = vmul.f32 %v988_v25, %v2079_v44  ;;  %v2192_v63 = vmul.f32 0.06666667, %v577_v16  ;;  %v991_v53 = vsub.f32 %v959_v0, %v2132_v10  ;;  %v1470_v28 = vround.rtne.f32 %v833_v31 }
 0x1a6   :  { %v582_v30 = vmax.f32 %v550_v9, 1e-05  ;;  %v579_v35 = vmax.f32 %v547_v15, 1e-05  ;;  %1563 = vrcp.f32 %v2190_v22  ;;  %v552_v8 = vsub.f32 %v1994_v3, %v2171_v4 }
 0x1a7   :  { %v1069_v62 = vcombine.low %v2176_v55, %v2187_v5  ;;  %v549_v44 = vsub.f32 %v2000_v13, %v2184_v41  ;;  %v989_v46 = vsub.f32 %v957_v18, %v2103_v61  ;;  %v897_v17 = vadd.f32 %v1470_v28, %v2178_v1  ;;  %v2213_v13 = vpop.xlane.xlu0 %494  ;;  %v2681_v55 = vld [vmem:[#allocation13_spill] sm:$0xff] }
 0x1a8   :  { %1565 = vrcp.f32 %v2192_v63  ;;  %v2205_v10 = vmul.f32 0.06666667, %v582_v30  ;;  %v1558_v6 = vpop.eup %1557  ;;  %v2209_v24 = vmul.f32 0.06666667, %v579_v35  ;;  %v584_v39 = vmax.f32 %v552_v8, 1e-05 }
 0x1a9   :  { %v581_v40 = vmax.f32 %v549_v44, 1e-05  ;;  %v648_v3 = vmul.f32 %v1558_v6, %v2097_v57  ;;  %v2216_v18 = vmul.f32 %v991_v53, %v2074_v32  ;;  %v554_v33 = vsub.f32 %v1998_v11, %v2207_v36  ;;  %v2674_v35 = vld [vmem:[#allocation10_spill] sm:$0xff] }
 0x1aa   :  { %1567 = vrcp.f32 %v2205_v10  ;;  %v2219_v56 = vmul.f32 0.06666667, %v584_v39  ;;  %v2224_v34 = vmul.f32 %v989_v46, %v2045_v60  ;;  %v929_v50 = vmax.f32 %v897_v17, 0.0 }
 0x1ab   :  { %v1560_v61 = vpop.eup %1559  ;;  %1569 = vrcp.f32 %v2209_v24  ;;  %v1435_v57 = vround.rtne.f32 %v648_v3  ;;  %v830_v58 = vmul.f32 %v1558_v6, %v1778_v20  ;;  %v2228_v0 = vmul.f32 0.06666667, %v581_v40  ;;  %v2675_v40 = vld [vmem:[#allocation9_spill] sm:$0xff] }
 0x1ac   :  { %v658_v59 = vmul.f32 %v1560_v61, %v2106_v49  ;;  %v586_v32 = vmax.f32 %v554_v33, 1e-05  ;;  %v551_v31 = vsub.f32 %v2004_v21, %v2213_v13  ;;  %v1113_v11 = vcombine.low %v2224_v34, %v2216_v18 }
 0x1ad   :  { %v734_v25 = vsub.f32 0.0, %v1435_v57  ;;  %v835_v60 = vmul.f32 %v1560_v61, %v1769_v12  ;;  %1571 = vrcp.f32 %v2219_v56  ;;  %v2239_v30 = vmin.f32 %v929_v50, 15.0 }
 0x1ae   :  { %v1440_v37 = vround.rtne.f32 %v658_v59  ;;  %v1562_v16 = vpop.eup %1561  ;;  %v583_v9 = vmax.f32 %v551_v31, 1e-05  ;;  %v2237_v53 = vmul.f32 0.06666667, %v586_v32  ;;  %v1467_v21 = vround.rtne.f32 %v830_v58 }
 0x1af   :  { %v766_v49 = vmax.f32 %v734_v25, 0.0  ;;  %v652_v20 = vmul.f32 %v1562_v16, %v2112_v29  ;;  %v832_v8 = vmul.f32 %v1562_v16, %v2674_v35  ;;  %1573 = vrcp.f32 %v2228_v0 }
 0x1b0   :  { %v739_v15 = vsub.f32 0.0, %v1440_v37  ;;  %v1564_v28 = vpop.eup %1563  ;;  %v2245_v6 = vmul.f32 0.06666667, %v583_v9  ;;  %v1472_v39 = vround.rtne.f32 %v835_v60  ;;  %1575 = vrcp.f32 %v2237_v53  ;;  %v2676_v37 = vld [vmem:[#allocation12_spill] sm:$0xff] }
 0x1b1   :  { %v2243_v46 = vmin.f32 %v766_v49, 15.0  ;;  %v1437_v17 = vround.rtne.f32 %v652_v20  ;;  %v662_v29 = vmul.f32 %v1564_v28, %v2125_v23  ;;  %v837_v3 = vmul.f32 %v1564_v28, %v2675_v40  ;;  %v2259_v28 = vpop.xlane.xlu0 %500 }
 0x1b2   :  { %v1566_v44 = vpop.eup %1565  ;;  %v771_v12 = vmax.f32 %v739_v15, 0.0  ;;  %v1469_v32 = vround.rtne.f32 %v832_v8  ;;  %1577 = vrcp.f32 %v2245_v6  ;;  %v2304_v18 = vrot.slane %v1069_v62, %v1702_v19 }
 0x1b3   :  { %v656_v61 = vmul.f32 %v1566_v44, %v2130_v43  ;;  %v894_v50 = vadd.f32 %v1467_v21, %v2243_v46  ;;  %v736_v59 = vsub.f32 0.0, %v1437_v17  ;;  %v1442_v31 = vround.rtne.f32 %v662_v29 }
 0x1b4   :  { %v1568_v33 = vpop.eup %1567  ;;  %v2251_v57 = vmin.f32 %v771_v12, 15.0  ;;  %v834_v16 = vmul.f32 %v1566_v44, %v2676_v37  ;;  %v1474_v49 = vround.rtne.f32 %v837_v3 }
 0x1b5   :  { %v1570_v58 = vpop.eup %1569  ;;  %v1439_v25 = vround.rtne.f32 %v656_v61  ;;  %v768_v60 = vmax.f32 %v736_v59, 0.0  ;;  %v666_v9 = vmul.f32 %v1568_v33, %v2140_v26  ;;  %v741_v43 = vsub.f32 0.0, %v1442_v31 }
 0x1b6   :  { %v899_v23 = vadd.f32 %v1472_v39, %v2251_v57  ;;  %v660_v20 = vmul.f32 %v1570_v58, %v2152_v38  ;;  %v926_v21 = vmax.f32 %v894_v50, 0.0  ;;  %v2677_v39 = vld [vmem:[#allocation11_spill] sm:$0xff]  ;;  %v1471_v37 = vround.rtne.f32 %v834_v16  ;;  %v2678_v50 = vld [vmem:[#allocation14_spill] sm:$0xff] }
 0x1b7   :  { %v738_v15 = vsub.f32 0.0, %v1439_v25  ;;  %v800_v8 = vmin.f32 %v768_v60, 15.0  ;;  %v1444_v12 = vround.rtne.f32 %v666_v9  ;;  %v1572_v17 = vpop.eup %1571  ;;  %v773_v44 = vmax.f32 %v741_v43, 0.0 }
 0x1b8   :  { %v931_v35 = vmax.f32 %v899_v23, 0.0  ;;  %v839_v40 = vmul.f32 %v1568_v33, %v2677_v39  ;;  %v1441_v61 = vround.rtne.f32 %v660_v20  ;;  %v836_v23 = vmul.f32 %v1570_v58, %v2678_v50  ;;  %v2679_v50 = vld [vmem:[#allocation28_spill] sm:$0xff] }
 0x1b9   :  { %v770_v29 = vmax.f32 %v738_v15, 0.0  ;;  %v896_v59 = vadd.f32 %v1469_v32, %v800_v8  ;;  %v743_v31 = vsub.f32 0.0, %v1444_v12  ;;  %v1574_v3 = vpop.eup %1573  ;;  %v2262_v25 = vmin.f32 %v773_v44, 15.0  ;;  %v2273_v12 = vpop.xlane.xlu0 %506 }
 0x1ba   :  { %v963_v26 = vmin.f32 %v931_v35, 15.0  ;;  %v740_v27 = vsub.f32 0.0, %v1441_v61  ;;  %v993_v60 = vsub.f32 %v2239_v30, %v2178_v1  ;;  %v958_v9 = vmin.f32 %v926_v21, 15.0  ;;  %v2271_v35 = vpop.xlane.xlu1 %509  ;;  %v1576_v44 = vpop.eup %1575 }
 0x1bb   :  { %v2264_v38 = vmin.f32 %v770_v29, 15.0  ;;  %v928_v43 = vmax.f32 %v896_v59, 0.0  ;;  %v775_v15 = vmax.f32 %v743_v31, 0.0  ;;  %v901_v33 = vadd.f32 %v1474_v49, %v2262_v25 }
 0x1bc   :  { %v1476_v16 = vround.rtne.f32 %v839_v40  ;;  %v772_v20 = vmax.f32 %v740_v27, 0.0  ;;  %v995_v29 = vsub.f32 %v963_v26, %v2251_v57  ;;  %v670_v1 = vmul.f32 %v1572_v17, %v2171_v4  ;;  %v1578_v59 = vpop.eup %1577 }
 0x1bd   :  { %v898_v32 = vadd.f32 %v1471_v37, %v2264_v38  ;;  %v960_v58 = vmin.f32 %v928_v43, 15.0  ;;  %v2276_v39 = vmin.f32 %v775_v15, 15.0  ;;  %v933_v30 = vmax.f32 %v901_v33, 0.0 }
 0x1be   :  { %v2279_v61 = vmin.f32 %v772_v20, 15.0  ;;  %v1473_v49 = vround.rtne.f32 %v836_v23  ;;  %v2285_v27 = vrot.slane %v1061_v45, %v1702_v19  ;;  %v1446_v26 = vround.rtne.f32 %v670_v1 }
 0x1bf   :  { %v930_v21 = vmax.f32 %v898_v32, 0.0  ;;  %v992_v40 = vsub.f32 %v960_v58, %v800_v8  ;;  %v903_v57 = vadd.f32 %v1476_v16, %v2276_v39  ;;  %v2292_v4 = vrot.slane %v1113_v11, %v1702_v19  ;;  %v2680_v8 = vld [vmem:[#allocation30_spill] sm:$0xff] }
 0x1c0   :  { %v965_v37 = vmin.f32 %v933_v30, 15.0  ;;  %v900_v31 = vadd.f32 %v1473_v49, %v2279_v61  ;;  %v556_v23 = vsub.f32 %v2679_v50, %v2271_v35  ;;  %v990_v51 = vsub.f32 %v958_v9, %v2243_v46  ;;  %v2313_v46 = vpop.xlane.xlu1 %515  ;;  %v2315_v9 = vpop.xlane.xlu0 %512 }
 0x1c1   :  { %v962_v48 = vmin.f32 %v930_v21, 15.0  ;;  %v745_v45 = vsub.f32 0.0, %v1446_v26  ;;  %v553_v43 = vsub.f32 %v2680_v8, %v2259_v28  ;;  %v2307_v34 = vmul.f32 %v993_v60, %v2085_v54 }
 0x1c2   :  { %v2310_v11 = vmul.f32 %v995_v29, %v2155_v2  ;;  %v664_v15 = vmul.f32 %v1574_v3, %v2184_v41  ;;  %v2318_v33 = vmul.f32 %v992_v40, %v2173_v14  ;;  %v935_v32 = vmax.f32 %v903_v57, 0.0  ;;  %v2682_v29 = vld [vmem:[#allocation16_spill] sm:$0xff] }
 0x1c3   :  { %v777_v16 = vmax.f32 %v745_v45, 0.0  ;;  %v841_v5 = vmul.f32 %v1572_v17, %v2681_v55  ;;  %v997_v62 = vsub.f32 %v965_v37, %v2262_v25  ;;  %v932_v54 = vmax.f32 %v900_v31, 0.0 }
 0x1c4   :  { %v1443_v60 = vround.rtne.f32 %v664_v15  ;;  %v588_v20 = vmax.f32 %v556_v23, 1e-05  ;;  %v2323_v2 = vmul.f32 %v990_v51, %v2148_v52  ;;  %v994_v41 = vsub.f32 %v962_v48, %v2264_v38  ;;  %v2338_v37 = vpop.xlane.xlu1 %521  ;;  %v2340_v31 = vpop.xlane.xlu0 %518  ;;  %v2683_v23 = vld [vmem:[#allocation15_spill] sm:$0xff] }
 0x1c5   :  { %v838_v58 = vmul.f32 %v1574_v3, %v2682_v29  ;;  %v585_v1 = vmax.f32 %v553_v43, 1e-05  ;;  %v1129_v14 = vcombine.low %v2307_v34, %v2310_v11  ;;  %v2329_v30 = vmin.f32 %v777_v16, 15.0 }
 0x1c6   :  { %v742_v21 = vsub.f32 0.0, %v1443_v60  ;;  %v674_v17 = vmul.f32 %v1576_v44, %v2207_v36  ;;  %v1121_v25 = vcombine.low %v2323_v2, %v2318_v33  ;;  %v967_v49 = vmin.f32 %v935_v32, 15.0  ;;  %v2684_v32 = vld [vmem:[#allocation18_spill] sm:$0xff]  ;;  %v2685_v60 = vld [vmem:[#allocation29_spill] sm:$0xff] }
 0x1c7   :  { %v1478_v40 = vround.rtne.f32 %v841_v5  ;;  %v668_v52 = vmul.f32 %v1578_v59, %v2213_v13  ;;  %v2336_v38 = vmul.f32 %v997_v62, %v2190_v22  ;;  %v964_v3 = vmin.f32 %v932_v54, 15.0 }
 0x1c8   :  { %v774_v57 = vmax.f32 %v742_v21, 0.0  ;;  %v1448_v26 = vround.rtne.f32 %v674_v17  ;;  %v2343_v50 = vmul.f32 %v994_v41, %v2192_v63  ;;  %v1475_v36 = vround.rtne.f32 %v838_v58  ;;  %v2369_v21 = vpop.xlane.xlu0 %524 }
 0x1c9   :  { %v843_v51 = vmul.f32 %v1576_v44, %v2683_v23  ;;  %v1445_v48 = vround.rtne.f32 %v668_v52  ;;  %v905_v45 = vadd.f32 %v1478_v40, %v2329_v30  ;;  %v2349_v8 = vmul.f32 0.06666667, %v588_v20  ;;  %v2688_v52 = vld [vmem:[#allocation34_spill] sm:$0xff] }
 0x1ca   :  { %v2347_v13 = vmin.f32 %v774_v57, 15.0  ;;  %v747_v22 = vsub.f32 0.0, %v1448_v26  ;;  %v999_v43 = vsub.f32 %v967_v49, %v2276_v39  ;;  %v840_v16 = vmul.f32 %v1578_v59, %v2684_v32  ;;  %v2686_v59 = vld [vmem:[#allocation32_spill] sm:$0xff] }
 0x1cb   :  { %v744_v15 = vsub.f32 0.0, %v1445_v48  ;;  %v2353_v55 = vmul.f32 0.06666667, %v585_v1  ;;  %v996_v63 = vsub.f32 %v964_v3, %v2279_v61  ;;  %1579 = vrcp.f32 %v2349_v8  ;;  %v2687_v61 = vld [vmem:[#allocation31_spill] sm:$0xff]  ;;  %v2367_v1 = vpop.xlane.xlu1 %527 }
 0x1cc   :  { %v902_v5 = vadd.f32 %v1475_v36, %v2347_v13  ;;  %v779_v44 = vmax.f32 %v747_v22, 0.0  ;;  %v1480_v62 = vround.rtne.f32 %v843_v51  ;;  %v558_v20 = vsub.f32 %v2685_v60, %v2313_v46  ;;  %v2689_v22 = vld [vmem:[#allocation33_spill] sm:$0xff] }
 0x1cd   :  { %v776_v54 = vmax.f32 %v744_v15, 0.0  ;;  %1581 = vrcp.f32 %v2353_v55  ;;  %v937_v39 = vmax.f32 %v905_v45, 0.0  ;;  %v555_v29 = vsub.f32 %v2686_v59, %v2273_v12 }
 0x1ce   :  { %v2361_v41 = vmin.f32 %v779_v44, 15.0  ;;  %v560_v58 = vsub.f32 %v2687_v61, %v2338_v37  ;;  %v1477_v49 = vround.rtne.f32 %v840_v16  ;;  %v590_v40 = vmax.f32 %v558_v20, 1e-05 }
 0x1cf   :  { %v2371_v17 = vmin.f32 %v776_v54, 15.0  ;;  %v557_v3 = vsub.f32 %v2688_v52, %v2315_v9  ;;  %v934_v57 = vmax.f32 %v902_v5, 0.0  ;;  %v587_v36 = vmax.f32 %v555_v29, 1e-05  ;;  %v2690_v29 = vld [vmem:[#allocation35_spill] sm:$0xff] }
 0x1d0   :  { %v907_v26 = vadd.f32 %v1480_v62, %v2361_v41  ;;  %v592_v23 = vmax.f32 %v560_v58, 1e-05  ;;  %v2377_v48 = vmul.f32 0.06666667, %v590_v40  ;;  %v562_v15 = vsub.f32 %v2689_v22, %v2367_v1 }
 0x1d1   :  { %v904_v51 = vadd.f32 %v1477_v49, %v2371_v17  ;;  %v589_v45 = vmax.f32 %v557_v3, 1e-05  ;;  %v1031_v32 = vmul.f32 %v999_v43, %v2205_v10  ;;  %v2382_v44 = vmul.f32 0.06666667, %v587_v36  ;;  %v2393_v10 = vpop.xlane.xlu0 %530 }
 0x1d2   :  { %v939_v16 = vmax.f32 %v907_v26, 0.0  ;;  %v2384_v54 = vmul.f32 0.06666667, %v592_v23  ;;  %v1028_v5 = vmul.f32 %v996_v63, %v2209_v24  ;;  %1583 = vrcp.f32 %v2377_v48  ;;  %v2691_v24 = vld [vmem:[#allocation36_spill] sm:$0xff] }
 0x1d3   :  { %v2388_v62 = vmul.f32 0.06666667, %v589_v45  ;;  %v594_v60 = vmax.f32 %v562_v15, 1e-05  ;;  %v969_v20 = vmin.f32 %v937_v39, 15.0  ;;  %v966_v59 = vmin.f32 %v934_v57, 15.0 }
 0x1d4   :  { %1585 = vrcp.f32 %v2382_v44  ;;  %v559_v61 = vsub.f32 %v2690_v29, %v2340_v31  ;;  %v936_v43 = vmax.f32 %v904_v51, 0.0  ;;  %v561_v63 = vsub.f32 %v2691_v24, %v2369_v21 }
 0x1d5   :  { %1587 = vrcp.f32 %v2384_v54  ;;  %v2396_v58 = vmul.f32 0.06666667, %v594_v60  ;;  %v1580_v49 = vpop.eup %1579  ;;  %v1181_v40 = vcombine.low %v2336_v38, %v1031_v32  ;;  %v971_v39 = vmin.f32 %v939_v16, 15.0  ;;  %v2692_v38 = vld [vmem:[#allocation37_spill] sm:$0xff]  ;;  %v2693_v32 = vld [vmem:[#allocation20_spill] sm:$0xff] }
 0x1d6   :  { %1589 = vrcp.f32 %v2388_v62  ;;  %v591_v52 = vmax.f32 %v559_v61, 1e-05  ;;  %v2406_v57 = vrot.slane %v1129_v14, %v1702_v19  ;;  %v2412_v26 = vrot.slane %v1121_v25, %v1702_v19 }
 0x1d7   :  { %v1582_v3 = vpop.eup %1581  ;;  %v678_v36 = vmul.f32 %v1580_v49, %v2271_v35  ;;  %v563_v23 = vsub.f32 %v2692_v38, %v2393_v10  ;;  %v1137_v51 = vcombine.low %v2343_v50, %v1028_v5  ;;  %v1001_v45 = vsub.f32 %v969_v20, %v2329_v30 }
 0x1d8   :  { %v672_v22 = vmul.f32 %v1582_v3, %v2259_v28  ;;  %1591 = vrcp.f32 %v2396_v58  ;;  %v998_v34 = vsub.f32 %v966_v59, %v2347_v13  ;;  %v968_v11 = vmin.f32 %v936_v43, 15.0  ;;  %v2694_v43 = vld [vmem:[#allocation17_spill] sm:$0xff] }
 0x1d9   :  { %v1450_v14 = vround.rtne.f32 %v678_v36  ;;  %v593_v33 = vmax.f32 %v561_v63, 1e-05  ;;  %v2423_v2 = vrot.slane %v1181_v40, %v1702_v19  ;;  %v1003_v35 = vsub.f32 %v971_v39, %v2361_v41 }
 0x1da   :  { %v1447_v25 = vround.rtne.f32 %v672_v22  ;;  %v2426_v15 = vmul.f32 0.06666667, %v591_v52  ;;  %v842_v30 = vmul.f32 %v1582_v3, %v2693_v32  ;;  %v595_v28 = vmax.f32 %v563_v23, 1e-05  ;;  %v2695_v23 = vld [vmem:[#allocation19_spill] sm:$0xff]  ;;  %v2696_v32 = vld [vmem:[#allocation22_spill] sm:$0xff] }
 0x1db   :  { %v749_v50 = vsub.f32 0.0, %v1450_v14  ;;  %v2429_v16 = vmul.f32 0.06666667, %v593_v33  ;;  %v2432_v5 = vrot.slane %v1137_v51, %v1702_v19  ;;  %v2435_v13 = vmul.f32 %v1001_v45, %v2219_v56 }
 0x1dc   :  { %v746_v60 = vsub.f32 0.0, %v1447_v25  ;;  %v1093_v20 = vcombine.low %v2285_v27, %v2304_v18  ;;  %v1584_v41 = vpop.eup %1583  ;;  %v2440_v59 = vmul.f32 %v998_v34, %v2228_v0  ;;  %v1000_v29 = vsub.f32 %v968_v11, %v2371_v17 }
 0x1dd   :  { %v781_v61 = vmax.f32 %v749_v50, 0.0  ;;  %v845_v24 = vmul.f32 %v1580_v49, %v2694_v43  ;;  %v2445_v40 = vmul.f32 %v1003_v35, %v2237_v53  ;;  %v682_v56 = vmul.f32 %v1584_v41, %v2313_v46 }
 0x1de   :  { %v1586_v63 = vpop.eup %1585  ;;  %v778_v39 = vmax.f32 %v746_v60, 0.0  ;;  %1593 = vrcp.f32 %v2426_v15  ;;  %v1479_v3 = vround.rtne.f32 %v842_v30  ;;  %v2451_v0 = vmul.f32 0.06666667, %v595_v28 }
 0x1df   :  { %v1588_v52 = vpop.eup %1587  ;;  %v676_v36 = vmul.f32 %v1586_v63, %v2273_v12  ;;  %1595 = vrcp.f32 %v2429_v16  ;;  %v1452_v49 = vround.rtne.f32 %v682_v56  ;;  %v847_v53 = vmul.f32 %v1584_v41, %v2695_v23 }
 0x1e0   :  { %v1590_v17 = vpop.eup %1589  ;;  %v2453_v38 = vmin.f32 %v778_v39, 15.0  ;;  %v686_v51 = vmul.f32 %v1588_v52, %v2338_v37  ;;  %v2458_v46 = vmul.f32 %v1000_v29, %v2245_v6  ;;  %v2460_v45 = vmin.f32 %v781_v61, 15.0  ;;  %v2697_v61 = vld [vmem:[#allocation24_spill] sm:$0xff] }
 0x1e1   :  { %v1482_v22 = vround.rtne.f32 %v845_v24  ;;  %v1449_v34 = vround.rtne.f32 %v676_v36  ;;  %v751_v14 = vsub.f32 0.0, %v1452_v49  ;;  %v680_v35 = vmul.f32 %v1590_v17, %v2315_v9  ;;  %v2698_v49 = vld [vmem:[#allocation21_spill] sm:$0xff] }
 0x1e2   :  { %v1592_v12 = vpop.eup %1591  ;;  %v906_v11 = vadd.f32 %v1479_v3, %v2453_v38  ;;  %v1454_v33 = vround.rtne.f32 %v686_v51  ;;  %v1197_v25 = vcombine.low %v2435_v13, %v2445_v40  ;;  %v844_v37 = vmul.f32 %v1586_v63, %v2696_v32  ;;  %v2700_v32 = vld [vmem:[#allocation8_spill] sm:$0xff] }
 0x1e3   :  { %v748_v50 = vsub.f32 0.0, %v1449_v34  ;;  %1597 = vrcp.f32 %v2451_v0  ;;  %v783_v6 = vmax.f32 %v751_v14, 0.0  ;;  %v1484_v30 = vround.rtne.f32 %v847_v53 }
 0x1e4   :  { %v753_v28 = vsub.f32 0.0, %v1454_v33  ;;  %v1451_v60 = vround.rtne.f32 %v680_v35  ;;  %v909_v41 = vadd.f32 %v1482_v22, %v2460_v45  ;;  %v846_v43 = vmul.f32 %v1590_v17, %v2697_v61  ;;  %v2699_v17 = vld [vmem:[#allocation23_spill] sm:$0xff] }
 0x1e5   :  { %v780_v29 = vmax.f32 %v748_v50, 0.0  ;;  %v690_v24 = vmul.f32 %v1592_v12, %v2367_v1  ;;  %v938_v9 = vmax.f32 %v906_v11, 0.0  ;;  %v2471_v39 = vmin.f32 %v783_v6, 15.0 }
 0x1e6   :  { %v785_v56 = vmax.f32 %v753_v28, 0.0  ;;  %v750_v3 = vsub.f32 0.0, %v1451_v60  ;;  %v1481_v63 = vround.rtne.f32 %v844_v37  ;;  %v849_v23 = vmul.f32 %v1588_v52, %v2698_v49 }
 0x1e7   :  { %v812_v36 = vmin.f32 %v780_v29, 15.0  ;;  %v1456_v51 = vround.rtne.f32 %v690_v24  ;;  %v1189_v34 = vcombine.low %v2440_v59, %v2458_v46  ;;  %v911_v22 = vadd.f32 %v1484_v30, %v2471_v39 }
 0x1e8   :  { %v1594_v53 = vpop.eup %1593  ;;  %v782_v14 = vmax.f32 %v750_v3, 0.0  ;;  %v851_v33 = vmul.f32 %v1592_v12, %v2699_v17  ;;  %v2478_v35 = vmin.f32 %v785_v56, 15.0  ;;  %v2484_v52 = vrot.slane %v1077_v42, %v2700_v32  ;;  %v2701_v17 = vld [vmem:[#allocation25_spill] sm:$0xff] }
 0x1e9   :  { %v1596_v1 = vpop.eup %1595  ;;  %v908_v11 = vadd.f32 %v1481_v63, %v812_v36  ;;  %v755_v50 = vsub.f32 0.0, %v1456_v51  ;;  %v941_v37 = vmax.f32 %v909_v41, 0.0  ;;  %v970_v6 = vmin.f32 %v938_v9, 15.0 }
 0x1ea   :  { %v2486_v28 = vmin.f32 %v782_v14, 15.0  ;;  %v1483_v59 = vround.rtne.f32 %v846_v43  ;;  %v1486_v30 = vround.rtne.f32 %v849_v23  ;;  %v684_v12 = vmul.f32 %v1594_v53, %v2340_v31 }
 0x1eb   :  { %v940_v46 = vmax.f32 %v908_v11, 0.0  ;;  %v787_v60 = vmax.f32 %v755_v50, 0.0  ;;  %v943_v29 = vmax.f32 %v911_v22, 0.0  ;;  %v1488_v24 = vround.rtne.f32 %v851_v33 }
 0x1ec   :  { %v910_v61 = vadd.f32 %v1483_v59, %v2486_v28  ;;  %v688_v56 = vmul.f32 %v1596_v1, %v2369_v21  ;;  %v913_v42 = vadd.f32 %v1486_v30, %v2478_v35  ;;  %v1453_v9 = vround.rtne.f32 %v684_v12  ;;  %v2702_v59 = vld [vmem:[#allocation26_spill] sm:$0xff] }
 0x1ed   :  { %v1598_v3 = vpop.eup %1597  ;;  %v972_v63 = vmin.f32 %v940_v46, 15.0  ;;  %v2492_v41 = vmin.f32 %v787_v60, 15.0  ;;  %v2494_v49 = vmin.f32 %v941_v37, 15.0  ;;  %v1002_v43 = vsub.f32 %v970_v6, %v2453_v38 }
 0x1ee   :  { %v942_v23 = vmax.f32 %v910_v61, 0.0  ;;  %v1455_v51 = vround.rtne.f32 %v688_v56  ;;  %v752_v14 = vsub.f32 0.0, %v1453_v9  ;;  %v848_v33 = vmul.f32 %v1594_v53, %v2701_v17 }
 0x1ef   :  { %v1004_v31 = vsub.f32 %v972_v63, %v812_v36  ;;  %v915_v22 = vadd.f32 %v1488_v24, %v2492_v41  ;;  %v2500_v21 = vrot.slane %v1189_v34, %v1702_v19  ;;  %v975_v11 = vmin.f32 %v943_v29, 15.0 }
 0x1f0   :  { %v754_v50 = vsub.f32 0.0, %v1455_v51  ;;  %v850_v46 = vmul.f32 %v1596_v1, %v2702_v59  ;;  %v945_v30 = vmax.f32 %v913_v42, 0.0  ;;  %v784_v38 = vmax.f32 %v752_v14, 0.0  ;;  %v2703_v51 = vld [vmem:[#allocation27_spill] sm:$0xff] }
 0x1f1   :  { %v1036_v37 = vmul.f32 %v1004_v31, %v2382_v44  ;;  %v947_v60 = vmax.f32 %v915_v22, 0.0  ;;  %v1034_v6 = vmul.f32 %v1002_v43, %v2353_v55  ;;  %v974_v36 = vmin.f32 %v942_v23, 15.0 }
 0x1f2   :  { %v786_v12 = vmax.f32 %v754_v50, 0.0  ;;  %v2509_v53 = vrot.slane %v1093_v20, %v2700_v32  ;;  %v1005_v34 = vsub.f32 %v2494_v49, %v2460_v45  ;;  %v816_v29 = vmin.f32 %v784_v38, 15.0 }
 0x1f3   :  { %v1485_v1 = vround.rtne.f32 %v848_v33  ;;  %v692_v44 = vmul.f32 %v1598_v3, %v2393_v10  ;;  %v1007_v61 = vsub.f32 %v975_v11, %v2471_v39  ;;  %v1205_v24 = vcombine.low %v1034_v6, %v1036_v37 }
 0x1f4   :  { %v2515_v56 = vmin.f32 %v786_v12, 15.0  ;;  %v1487_v55 = vround.rtne.f32 %v850_v46  ;;  %v977_v63 = vmin.f32 %v945_v30, 15.0  ;;  %v979_v42 = vmin.f32 %v947_v60, 15.0 }
 0x1f5   :  { %v912_v9 = vadd.f32 %v1485_v1, %v816_v29  ;;  %v1457_v43 = vround.rtne.f32 %v692_v44  ;;  %v1006_v20 = vsub.f32 %v974_v36, %v2486_v28  ;;  %v1109_v45 = vcombine.low %v2484_v52, %v2509_v53 }
 0x1f6   :  { %v914_v23 = vadd.f32 %v1487_v55, %v2515_v56  ;;  %v1110_v10 = vcombine.high %v2484_v52, %v2509_v53  ;;  %v852_v31 = vmul.f32 %v1598_v3, %v2703_v51  ;;  %v1145_v22 = vcombine.low %v2292_v4, %v2412_v26 }
 0x1f7   :  { %v944_v49 = vmax.f32 %v912_v9, 0.0  ;;  %v756_v39 = vsub.f32 0.0, %v1457_v43  ;;  %v2527_v14 = vrot.slane %v1205_v24, %v1702_v19  ;;  %v1161_v28 = vcombine.low %v2406_v57, %v2432_v5 }
 0x1f8   :  { %v946_v17 = vmax.f32 %v914_v23, 0.0  ;;  %v1094_v33 = vcombine.high %v2285_v27, %v2304_v18  ;;  %v1011_v11 = vsub.f32 %v979_v42, %v2492_v41  ;;  %v2704_v3 = vcombine.high %v2146_v47, %v2158_v7 }
 0x1f9   :  { %v976_v50 = vmin.f32 %v944_v49, 15.0  ;;  %v788_v59 = vmax.f32 %v756_v39, 0.0  ;;  %v2539_v37 = vrot.slane %v1145_v22, %v2700_v32  ;;  %v2542_v30 = vrot.slane %v1161_v28, %v2700_v32 }
 0x1fa   :  { %v1092_v46 = vrot.slane %v2704_v3, %v2700_v32  ;;  %v1108_v60 = vrot.slane %v1094_v33, %v2700_v32  ;;  %v1146_v27 = vcombine.high %v2292_v4, %v2412_v26  ;;  %v1489_v38 = vround.rtne.f32 %v852_v31 }
 0x1fb   :  { %v1008_v18 = vsub.f32 %v976_v50, %v816_v29  ;;  %v820_v41 = vmin.f32 %v788_v59, 15.0  ;;  %v1162_v6 = vcombine.high %v2406_v57, %v2432_v5  ;;  %v978_v36 = vmin.f32 %v946_v17, 15.0 }
 0x1fc   :  { %v1178_v47 = vcombine.high %v2539_v37, %v2542_v30  ;;  %v1177_v7 = vcombine.low %v2539_v37, %v2542_v30  ;;  %v1111_v12 = vcombine.low %v1092_v46, %v1108_v60  ;;  %v1160_v24 = vrot.slane %v1146_v27, %v2700_v32 }
 0x1fd   :  { %v1040_v1 = vmul.f32 %v1008_v18, %v2426_v15  ;;  %v916_v44 = vadd.f32 %v1489_v38, %v820_v41  ;;  %v1176_v4 = vrot.slane %v1162_v6, %v2700_v32  ;;  %v1204_v57 = vrot.slane %v1197_v25, %v1702_v19 }
 0x1fe   :  { %v1039_v26 = vmul.f32 %v1007_v61, %v2377_v48  ;;  %v1009_v5 = vsub.f32 %v977_v63, %v2478_v35  ;;  %v1505_v29 = vpack.i.bf16 %v1178_v47, %v1110_v10  ;;  %v1038_v55 = vmul.f32 %v1006_v20, %v2388_v62 }
 0x1ff   :  { %v948_v42 = vmax.f32 %v916_v44, 0.0  ;;  %v1179_v9 = vcombine.low %v1160_v24, %v1176_v4  ;;  %v1213_v15 = vcombine.low %v2423_v2, %v2500_v21  ;;  %v1037_v43 = vmul.f32 %v1005_v34, %v2349_v8 }
 0x200   :  { %v1043_v23 = vmul.f32 %v1011_v11, %v2396_v58  ;;  %1506 = vrot.lane.b32.xlu1 %v1505_v29, %s1656_s22  ;;  %v1229_v13 = vcombine.low %v1204_v57, %v2527_v14  ;;  %v1112_v48 = vcombine.high %v1092_v46, %v1108_v60  ;;  %v1257_v40 = vcombine.low %v1038_v55, %v1040_v1 }
 0x201   :  { %v1010_v25 = vsub.f32 %v978_v36, %v2515_v56  ;;  %v980_v35 = vmin.f32 %v948_v42, 15.0  ;;  %v1515_v62 = vpack.i.bf16 %v1179_v9, %v1111_v12  ;;  %v1221_v61 = vrot.slane %v1213_v15, %v2700_v32 }
 0x202   :  { %v1237_v63 = vrot.slane %v1229_v13, %v2700_v32  ;;  %v1180_v20 = vcombine.high %v1160_v24, %v1176_v4  ;;  %v1249_v10 = vcombine.low %v1037_v43, %v1039_v26  ;;  %v1041_v8 = vmul.f32 %v1009_v5, %v2384_v54 }
 0x203   :  { %v1012_v58 = vsub.f32 %v980_v35, %v820_v41  ;;  %v1264_v51 = vrot.slane %v1257_v40, %v1702_v19  ;;  %v1042_v56 = vmul.f32 %v1010_v25, %v2429_v16  ;;  %v1230_v22 = vcombine.high %v1204_v57, %v2527_v14 }
 0x204   :  { %1516 = vrot.lane.b32.xlu1 %v1515_v62, %s1657_s23  ;;  %v1245_v34 = vcombine.low %v1221_v61, %v1237_v63  ;;  %v1525_v49 = vpack.i.bf16 %v1180_v20, %v1112_v48  ;;  %v1265_v39 = vcombine.low %v1041_v8, %v1043_v23  ;;  %v1256_v17 = vrot.slane %v1249_v10, %v1702_v19 }
 0x205   :  { %v1044_v31 = vmul.f32 %v1012_v58, %v2451_v0  ;;  %v1214_v54 = vcombine.high %v2423_v2, %v2500_v21  ;;  %v1244_v3 = vrot.slane %v1230_v22, %v2700_v32  ;;  %v1246_v41 = vcombine.high %v1221_v61, %v1237_v63 }
 0x206   :  { %v1272_v33 = vrot.slane %v1265_v39, %v1702_v19  ;;  %v1282_v50 = vcombine.high %v1256_v17, %v1264_v51  ;;  %v1281_v59 = vcombine.low %v1256_v17, %v1264_v51 }
 0x207   :  { %v1273_v28 = vcombine.low %v1042_v56, %v1044_v31  ;;  %v1228_v0 = vrot.slane %v1214_v54, %v2700_v32 }
 0x208   :  { %v1296_v14 = vrot.slane %v1282_v50, %v2700_v32  ;;  %v1289_v27 = vrot.slane %v1281_v59, %v2700_v32 }
 0x209   :  { %v1280_v11 = vrot.slane %v1273_v28, %v1702_v19  ;;  %v1247_v21 = vcombine.low %v1228_v0, %v1244_v3  ;;  %v1248_v12 = vcombine.high %v1228_v0, %v1244_v3 }
 0x20b   :  { %v1298_v46 = vcombine.high %v1272_v33, %v1280_v11  ;;  %v1297_v16 = vcombine.low %v1272_v33, %v1280_v11 }
 0x20d   :  { %v1312_v60 = vrot.slane %v1298_v46, %v2700_v32  ;;  %v1305_v2 = vrot.slane %v1297_v16, %v2700_v32 }
 0x20f   :  { %v1315_v18 = vcombine.low %v1296_v14, %v1312_v60  ;;  %v1314_v19 = vcombine.high %v1289_v27, %v1305_v2  ;;  %v1313_v38 = vcombine.low %v1289_v27, %v1305_v2  ;;  %v1316_v47 = vcombine.high %v1296_v14, %v1312_v60 }
 0x211   :  { %v1520_v6 = vpack.i.bf16 %v1315_v18, %v1247_v21  ;;  %v1510_v36 = vpack.i.bf16 %v1314_v19, %v1246_v41  ;;  %v1530_v1 = vpack.i.bf16 %v1316_v47, %v1248_v12 }
 0x213   :  { %1521 = vrot.lane.b32.xlu1 %v1520_v6, %s1657_s23  ;;  %1511 = vrot.lane.b32.xlu0 %v1510_v36, %s1656_s22 }
 0x217   :  { %1531 = vrot.lane.b32.xlu1 %v1530_v1, %s1658_s24  ;;  %1526 = vrot.lane.b32.xlu0 %v1525_v49, %s1658_s24 }
 0x272   :  { %v1507_v44 = vpop.permute.xlu1 %1506 }
 0x273   :  { %v1509_v32 = vunpack.i.h.bf16 %v1507_v44  ;;  %v1508_v4 = vunpack.i.l.bf16 %v1507_v44 }
 0x275   :  { %v1366_v13 = vsel %vm1365_vm1, %v1109_v45, %v1508_v4  ;;  %v1367_v48 = vsel %vm1365_vm1, %v1177_v7, %v1509_v32 }
 0x276   :  { %v1517_v24 = vpop.permute.xlu1 %1516 }
 0x277   :  { %v1519_v55 = vunpack.i.h.bf16 %v1517_v24  ;;  %v1518_v42 = vunpack.i.l.bf16 %v1517_v24 }
 0x279   :  { %v1371_v20 = vsel %vm1370_vm2, %v1366_v13, %v1518_v42  ;;  %v1372_v10 = vsel %vm1370_vm2, %v1367_v48, %v1519_v55 }
 0x285   :  { %v1522_v57 = vpop.permute.xlu1 %1521  ;;  %v1512_v26 = vpop.permute.xlu0 %1511 }
 0x286   :  { %v1514_v5 = vunpack.i.h.bf16 %v1512_v26  ;;  %v1513_v29 = vunpack.i.l.bf16 %v1512_v26  ;;  %v1524_v9 = vunpack.i.h.bf16 %v1522_v57  ;;  %v1523_v15 = vunpack.i.l.bf16 %v1522_v57 }
 0x288   :  { %v1368_v43 = vsel %vm1365_vm1, %v1245_v34, %v1513_v29  ;;  %v1369_v23 = vsel %vm1365_vm1, %v1313_v38, %v1514_v5 }
 0x289   :  { %v1532_v40 = vpop.permute.xlu1 %1531  ;;  %v1527_v25 = vpop.permute.xlu0 %1526  ;;  %v1373_v52 = vsel %vm1370_vm2, %v1368_v43, %v1523_v15  ;;  %v1374_v53 = vsel %vm1370_vm2, %v1369_v23, %v1524_v9 }
 0x28a   :  { %v1534_v35 = vunpack.i.h.bf16 %v1532_v40  ;;  %v1533_v62 = vunpack.i.l.bf16 %v1532_v40  ;;  %v1529_v61 = vunpack.i.h.bf16 %v1527_v25  ;;  %v1528_v63 = vunpack.i.l.bf16 %v1527_v25 }
 0x28c   :  { %v1378_v45 = vsel %vm1375_vm3, %v1373_v52, %v1533_v62  ;;  %v1379_v37 = vsel %vm1375_vm3, %v1374_v53, %v1534_v35  ;;  %v1377_v30 = vsel %vm1375_vm3, %v1372_v10, %v1529_v61  ;;  %v1376_v7 = vsel %vm1375_vm3, %v1371_v20, %v1528_v63 }
 0x28d   :  { %v1424_v8 = vpack.c.bf16 %v1378_v45, %v1378_v45  ;;  %v1425_v58 = vpack.c.bf16 %v1379_v37, %v1379_v37  ;;  %v1423_v34 = vpack.c.bf16 %v1377_v30, %v1377_v30  ;;  %v1422_v49 = vpack.c.bf16 %v1376_v7, %v1376_v7 }
 0x28f   :  { %1399 = vst.msk [vmem:[#allocation5 + $0x8] sm:$0xf] %vm1396_vm4, %v1424_v8  ;;  %1400 = vst.msk [vmem:[#allocation5 + $0xc] sm:$0xf] %vm1396_vm4, %v1425_v58 }
 0x290   :  { %1398 = vst.msk [vmem:[#allocation5 + $0x4] sm:$0xf] %vm1396_vm4, %v1423_v34  ;;  %1397 = vst.msk [vmem:[#allocation5] sm:$0xf] %vm1396_vm4, %v1422_v49 }
 0x291   :  { %1632 = shalt.err (!%p1629_p12)
}
 0x292   :  { %s1633_s30 = scalar_lea.hbm %s2622_s1, 256 }
 0x293   :  { %p1634_p13 = scmp.ne.s32.totalorder %s2622_s1, %s1633_s30  ;;  %p1637_p0 = scmp.lt.u32.totalorder %s1633_s30, %s2622_s1 }
 0x295   :  { %p1639_p1 = pnand %p1637_p0, %p1634_p13 }
 0x297   :  { %1642 = shalt.err (!%p1639_p1)
}
 0x298   :  { %s1660_s6 = smov 64   ;;  %s1661_s7 = smov 4  }
 0x299   :  { %1412 = dma.vmem_to_hbm [thread:$0]  %s1407_s26, 256, %s2622_s1, [#allocation4], %s1660_s6, %s1660_s6, %s1661_s7  }
 0x29a   :  { %1645 = dma.done.wait [#allocation4], 256  }
 0x29b   :  { %1646 = vsyncadd [#allocation4], 4294967040 }
 0x29c   :  { %1416 = vsyncpa [#allocation3], 1 }
 0x29d   :  { %1417 = vsyncpa [#allocation4], 1 }

</bundles_post_ra>
